<compile_context>
chip_gen: v6e
topology: v6e:2x2x1
jax: 0.10.0
libtpu: 0.0.40
codegen_flags: <defaults>
</compile_context>

<pallas_src>
import functools

import jax
import jax.numpy as jnp
from jax.experimental import pallas as pl
from jax.experimental.pallas import tpu as pltpu


def _round_up(x, m):
    return (x + m - 1) // m * m


def _pick_tile(s, target=512):
    """Largest divisor of s that is <= target, preferring multiples of 128."""
    divs = [t for t in range(1, min(s, target) + 1) if s % t == 0]
    lane_divs = [t for t in divs if t % 128 == 0]
    return (lane_divs or divs)[-1]


# ---------------------------------------------------------------------------
# Pass A: conv as lane-dense matmul  y^T = W^T (C_out, K_pad) @ X^T (K_pad, R)
#         + per-tile partial BatchNorm statistics.
# ---------------------------------------------------------------------------
def _conv_stats_kernel(x_ref, w_ref, y_ref, st_ref):
    y = jnp.dot(w_ref[...], x_ref[...],
                preferred_element_type=jnp.float32)            # (C_out, tile_R)
    y_ref[...] = y
    st_ref[0, :, 0:1] = jnp.sum(y, axis=1, keepdims=True)       # per-ch sum
    st_ref[0, :, 1:2] = jnp.sum(y * y, axis=1, keepdims=True)   # per-ch sumsq


def _conv_pass(xt, wt, n_batch, t_blocks, tile_r):
    k_pad, r = xt.shape
    c_out = wt.shape[0]
    g = n_batch * t_blocks
    return pl.pallas_call(
        _conv_stats_kernel,
        out_shape=(jax.ShapeDtypeStruct((c_out, r), jnp.float32),
                   jax.ShapeDtypeStruct((g, c_out, 2), jnp.float32)),
        grid=(n_batch, t_blocks),
        in_specs=[
            pl.BlockSpec((k_pad, tile_r),
                         lambda nb, t: (0, nb * t_blocks + t)),
            pl.BlockSpec((c_out, k_pad), lambda nb, t: (0, 0)),
        ],
        out_specs=(
            pl.BlockSpec((c_out, tile_r),
                         lambda nb, t: (0, nb * t_blocks + t)),
            pl.BlockSpec((1, c_out, 2),
                         lambda nb, t: (nb * t_blocks + t, 0, 0)),
        ),
        compiler_params=pltpu.CompilerParams(
            dimension_semantics=("parallel", "parallel")),
    )(xt, wt)


# ---------------------------------------------------------------------------
# Pass B: fused  (BN affine) [-> ReLU] -> (FiLM affine) [-> ReLU]  epilogue.
# Per-(batch, channel) parameters arrive pre-combined as prm (N, 4, C, 1) and
# the right batch row is selected by the BlockSpec index_map.
# ---------------------------------------------------------------------------
def _bn_film_kernel(y_ref, p_ref, o_ref, *, relu_mid, relu_end):
    bn_a = p_ref[0, 0]     # (C, 1)  gamma * rsqrt(var + eps)
    bn_b = p_ref[0, 1]     # (C, 1)  beta - mean * bn_a
    f_sc = p_ref[0, 2]     # (C, 1)  1 + FiLM scale   (per batch)
    f_sh = p_ref[0, 3]     # (C, 1)  FiLM shift       (per batch)
    z = y_ref[...] * bn_a + bn_b
    if relu_mid:
        z = jnp.maximum(z, 0.0)
    z = z * f_sc + f_sh
    if relu_end:
        z = jnp.maximum(z, 0.0)
    o_ref[...] = z


def _affine_pass(y, prm, n_batch, t_blocks, tile_r, *, relu_mid, relu_end):
    c_out, r = y.shape
    kern = functools.partial(_bn_film_kernel,
                             relu_mid=relu_mid, relu_end=relu_end)
    return pl.pallas_call(
        kern,
        out_shape=jax.ShapeDtypeStruct((c_out, r), jnp.float32),
        grid=(n_batch, t_blocks),
        in_specs=[
            pl.BlockSpec((c_out, tile_r),
                         lambda nb, t: (0, nb * t_blocks + t)),
            pl.BlockSpec((1, 4, c_out, 1), lambda nb, t: (nb, 0, 0, 0)),
        ],
        out_specs=pl.BlockSpec((c_out, tile_r),
                               lambda nb, t: (0, nb * t_blocks + t)),
        compiler_params=pltpu.CompilerParams(
            dimension_semantics=("parallel", "parallel")),
    )(y, prm)


# ---------------------------------------------------------------------------
# JAX-side glue (tiny): embedding MLP, stat combine, im2col construction.
# ---------------------------------------------------------------------------
def _film_scale_shift(z, w1, b1, w2, b2):
    hdn = z @ w1 + b1
    hdn = hdn * jax.nn.sigmoid(hdn)                     # SiLU
    e = hdn @ w2 + b2                                   # (N, 2*C)
    c = e.shape[1] // 2
    return e[:, :c], e[:, c:]                           # scale, shift


def _bn_film_params(stats, count, gamma, beta, scale, shift):
    # stats (G, C, 2): per-tile [sum, sumsq] of the raw (bias-free) conv out.
    s1 = jnp.sum(stats[:, :, 0], axis=0)
    s2 = jnp.sum(stats[:, :, 1], axis=0)
    mean = s1 / count
    var = s2 / count - mean * mean                      # biased train-mode var
    a = gamma * jax.lax.rsqrt(var + 1e-5)
    b = beta - mean * a
    nb, c = scale.shape
    prm = jnp.stack([jnp.broadcast_to(a, (nb, c)),
                     jnp.broadcast_to(b, (nb, c)),
                     1.0 + scale, shift], axis=1)       # (N, 4, C)
    return prm[..., None].astype(jnp.float32)           # (N, 4, C, 1)


def _im2col_T(x_ndhwc):
    """(N,D,H,W,C) -> (27*C, N*D*H*W); K ordered (kd,kh,kw) outer, ci inner."""
    n, d, h, w, c = x_ndhwc.shape
    xp = jnp.pad(x_ndhwc, ((0, 0), (1, 1), (1, 1), (1, 1), (0, 0)))
    cols = []
    for kd in range(3):
        for kh in range(3):
            for kw in range(3):
                cols.append(xp[:, kd:kd + d, kh:kh + h, kw:kw + w, :])
    p = jnp.stack(cols, axis=0)                         # (27, N, D, H, W, C)
    p = jnp.moveaxis(p, 5, 1)                           # (27, C, N, D, H, W)
    return p.reshape(27 * c, n * d * h * w)


def _conv_bn_block(x_ndhwc, w_kkkio, gamma, beta, scale, shift, tile_r, *,
                   relu_mid, relu_end, use_bf16):
    n, d, h, w, c_in = x_ndhwc.shape
    c_out = w_kkkio.shape[-1]
    r = n * d * h * w
    t_blocks = (d * h * w) // tile_r

    k = 27 * c_in
    k_pad = _round_up(k, 128)                           # pad K for the MXU
    xt = jnp.pad(_im2col_T(x_ndhwc), ((0, k_pad - k), (0, 0)))   # (K_pad, R)
    wt = jnp.pad(w_kkkio.reshape(k, c_out).T, ((0, 0), (0, k_pad - k)))

    if use_bf16:                                        # MXU operands only
        xt = xt.astype(jnp.bfloat16)
        wt = wt.astype(jnp.bfloat16)

    y, stats = _conv_pass(xt, wt, n, t_blocks, tile_r)  # (C_out, R), f32
    prm = _bn_film_params(stats, float(r), gamma, beta, scale, shift)
    return _affine_pass(y, prm, n, t_blocks, tile_r,
                        relu_mid=relu_mid, relu_end=relu_end)    # (C_out, R)


def mid_blocks_forward(x_ncdhw, z_prjs, p, use_bf16=False):
    """MidBlocks.forward: x (N, C, D, H, W), z_prjs (N, 5) -> (N, C, D, H, W)."""
    n, c1, d, h, w = x_ncdhw.shape
    c2 = p['conv1_w'].shape[-1]
    s_per_batch = d * h * w
    assert s_per_batch % 128 == 0, "D*H*W must be a multiple of 128"
    tile_r = _pick_tile(s_per_batch)

    # Embedding MLPs hoisted to plain JAX (tiny; computed once per call).
    sc1, sh1 = _film_scale_shift(z_prjs, p['e1_w1'], p['e1_b1'],
                                 p['e1_w2'], p['e1_b2'])         # (N, C2)
    sc2, sh2 = _film_scale_shift(z_prjs, p['e2_w1'], p['e2_b1'],
                                 p['e2_w2'], p['e2_b2'])         # (N, C1)

    x_cl = jnp.transpose(x_ncdhw, (0, 2, 3, 4, 1))               # NDHWC

    # Block 1: Conv3d(C1->C2) + BN1 + FiLM1 + ReLU (first op of MidConv2).
    h1 = _conv_bn_block(x_cl, p['conv1_w'],
                        p['bn1_g'].reshape(-1), p['bn1_b'].reshape(-1),
                        sc1, sh1, tile_r,
                        relu_mid=False, relu_end=True, use_bf16=use_bf16)

    h1_cl = jnp.transpose(h1.reshape(c2, n, d, h, w), (1, 2, 3, 4, 0))

    # Block 2: Conv3d(C2->C1) + BN2 + ReLU + FiLM2.
    out = _conv_bn_block(h1_cl, p['conv2_w'],
                         p['bn2_g'].reshape(-1), p['bn2_b'].reshape(-1),
                         sc2, sh2, tile_r,
                         relu_mid=True, relu_end=False, use_bf16=use_bf16)

    return jnp.transpose(out.reshape(c1, n, d, h, w), (1, 0, 2, 3, 4))


def init_params(key, num_ch):
    """Deterministic synthetic parameters matching MidBlocks(num_ch) shapes."""
    c1, c2 = num_ch, 2 * num_ch
    ks = jax.random.split(key, 16)
    nrm = lambda k, shape, s=0.1: s * jax.random.normal(k, shape, jnp.float32)
    return dict(
        conv1_w=nrm(ks[0], (3, 3, 3, c1, c2)),   # Conv3d(c1 -> 2*c1, k=3, pad=1)
        conv1_b=nrm(ks[1], (1, c2)),
        bn1_g=1.0 + nrm(ks[2], (1, c2)),         # BatchNorm3d(2*c1)
        bn1_b=nrm(ks[3], (1, c2)),
        conv2_w=nrm(ks[4], (3, 3, 3, c2, c1)),   # Conv3d(2*c1 -> c1, k=3, pad=1)
        conv2_b=nrm(ks[5], (1, c1)),
        bn2_g=1.0 + nrm(ks[6], (1, c1)),         # BatchNorm3d(c1)
        bn2_b=nrm(ks[7], (1, c1)),
        # Embeding_Layer(2*num_ch): Linear(5,10), Linear(10, 4*num_ch)
        e1_w1=nrm(ks[8], (5, 10)), e1_b1=nrm(ks[9], (1, 10)),
        e1_w2=nrm(ks[10], (10, 2 * c2)), e1_b2=nrm(ks[11], (1, 2 * c2)),
        # Embeding_Layer(num_ch): Linear(5,10), Linear(10, 2*num_ch)
        e2_w1=nrm(ks[12], (5, 10)), e2_b1=nrm(ks[13], (1, 10)),
        e2_w2=nrm(ks[14], (10, 2 * c1)), e2_b2=nrm(ks[15], (1, 2 * c1)),
    )


# ---------------------------- pure-JAX reference ----------------------------
def _ref_forward(x, z, p):
    def conv(xx, wk, b):
        w_oidhw = jnp.transpose(wk, (4, 3, 0, 1, 2))
        y = jax.lax.conv_general_dilated(
            xx, w_oidhw, (1, 1, 1), ((1, 1), (1, 1), (1, 1)),
            dimension_numbers=('NCDHW', 'OIDHW', 'NCDHW'))
        return y + b.reshape(1, -1, 1, 1, 1)

    def bn(xx, g, b):
        mu = jnp.mean(xx, axis=(0, 2, 3, 4), keepdims=True)
        var = jnp.mean((xx - mu) ** 2, axis=(0, 2, 3, 4), keepdims=True)
        return ((xx - mu) * jax.lax.rsqrt(var + 1e-5) * g.reshape(1, -1, 1, 1, 1)
                + b.reshape(1, -1, 1, 1, 1))

    def embd(xx, zz, w1, b1, w2, b2):
        hdn = zz @ w1 + b1
        hdn = hdn * jax.nn.sigmoid(hdn)
        e = hdn @ w2 + b2
        c = e.shape[1] // 2
        scale = e[:, :c][:, :, None, None, None]
        shift = e[:, c:][:, :, None, None, None]
        return xx * (1.0 + scale) + shift

    y = bn(conv(x, p['conv1_w'], p['conv1_b']), p['bn1_g'], p['bn1_b'])
    y = embd(y, z, p['e1_w1'], p['e1_b1'], p['e1_w2'], p['e1_b2'])
    y = jax.nn.relu(y)
    y = bn(conv(y, p['conv2_w'], p['conv2_b']), p['bn2_g'], p['bn2_b'])
    y = jax.nn.relu(y)
    y = embd(y, z, p['e2_w1'], p['e2_b1'], p['e2_w2'], p['e2_b2'])
    return y


if __name__ == "__main__":
    key = jax.random.PRNGKey(0)
    kx, kz, kp = jax.random.split(key, 3)
    num_ch, n, d, h, w = 4, 2, 8, 8, 8

    x = jax.random.normal(kx, (n, num_ch, d, h, w), jnp.float32)
    z_prjs = jax.random.normal(kz, (n, 5), jnp.float32)
    params = init_params(kp, num_ch)

    fwd = jax.jit(functools.partial(mid_blocks_forward, use_bf16=False))
    out = jax.block_until_ready(fwd(x, z_prjs, params))
    ref = jax.block_until_ready(_ref_forward(x, z_prjs, params))

    assert out.shape == (n, num_ch, d, h, w)
    err = float(jnp.max(jnp.abs(out - ref)))
    assert err < 3e-3, f"f32 path mismatch vs reference: {err}"

    # bf16 MXU-operand path (v6e/v7x option from the perf review); loose check.
    fwd16 = jax.jit(functools.partial(mid_blocks_forward, use_bf16=True))
    out16 = jax.block_until_ready(fwd16(x, z_prjs, params))
    err16 = float(jnp.max(jnp.abs(out16 - ref)))
    assert err16 < 1e-1, f"bf16 path mismatch vs reference: {err16}"

    print("KERNEL_OK")
</pallas_src>

<mosaic_0001>
module attributes {stable_mosaic.version = 11 : i64} {
  func.func @_conv_stats_kernel(%arg0: i32, %arg1: i32, %arg2: memref<128x512xf32, #tpu.memory_space<vmem>>, %arg3: memref<8x128xf32, #tpu.memory_space<vmem>>, %arg4: memref<8x512xf32, #tpu.memory_space<vmem>>, %arg5: memref<1x8x2xf32, #tpu.memory_space<vmem>>) attributes {dimension_semantics = [#tpu.dimension_semantics<parallel>, #tpu.dimension_semantics<parallel>], iteration_bounds = array<i64: 2, 1>, scalar_prefetch = 0 : i64, scratch_operands = 0 : i64, tpu.core_type = #tpu.core_type<tc>, window_params = [{transform_indices = @transform_0, window_bounds = array<i64: 128, 512>}, {pipeline_mode = #tpu.pipeline_mode<synchronous>, transform_indices = @transform_1, window_bounds = array<i64: 8, 128>}, {transform_indices = @transform_2, window_bounds = array<i64: 8, 512>}, {transform_indices = @transform_3, window_bounds = array<i64: 1, 8, 2>}]} {
    %c0 = arith.constant 0 : index
    %c0_0 = arith.constant 0 : index
    %0 = vector.load %arg3[%c0, %c0_0] : memref<8x128xf32, #tpu.memory_space<vmem>>, vector<8x128xf32>
    %c0_1 = arith.constant 0 : index
    %c0_2 = arith.constant 0 : index
    %1 = vector.load %arg2[%c0_1, %c0_2] : memref<128x512xf32, #tpu.memory_space<vmem>>, vector<128x512xf32>
    %cst = arith.constant dense<0.000000e+00> : vector<8x512xf32>
    %2 = tpu.matmul %0, %1, %cst {dimension_numbers = #tpu.dot_dimension_numbers<[1], [0], [0], [1], [0, 0, 1, 1], [], []>} : vector<8x128xf32>, vector<128x512xf32>, vector<8x512xf32> -> vector<8x512xf32>
    %c0_3 = arith.constant 0 : index
    %c0_4 = arith.constant 0 : index
    %3 = vector.load %arg4[%c0_3, %c0_4] : memref<8x512xf32, #tpu.memory_space<vmem>>, vector<8x512xf32>
    tpu.vector_store %arg4[%c0_3, %c0_4], %2 {strides = array<i32>} : memref<8x512xf32, #tpu.memory_space<vmem>>, vector<8x512xf32>,
    %cst_5 = arith.constant dense<0.000000e+00> : vector<8xf32>
    %4 = vector.multi_reduction <add>, %2, %cst_5 [1] : vector<8x512xf32> to vector<8xf32>
    %5 = vector.shape_cast %4 : vector<8xf32> to vector<8x1xf32>
    %c0_6 = arith.constant 0 : index
    %c0_7 = arith.constant 0 : index
    %c0_8 = arith.constant 0 : index
    %6 = vector.load %arg5[%c0_6, %c0_7, %c0_8] : memref<1x8x2xf32, #tpu.memory_space<vmem>>, vector<1x8x1xf32>
    %7 = vector.shape_cast %6 : vector<1x8x1xf32> to vector<8x1xf32>
    %8 = vector.shape_cast %5 : vector<8x1xf32> to vector<1x8x1xf32>
    tpu.vector_store %arg5[%c0_6, %c0_7, %c0_8], %8 {strides = array<i32>} : memref<1x8x2xf32, #tpu.memory_space<vmem>>, vector<1x8x1xf32>,
    %9 = arith.mulf %2, %2 : vector<8x512xf32>
    %cst_9 = arith.constant dense<0.000000e+00> : vector<8xf32>
    %10 = vector.multi_reduction <add>, %9, %cst_9 [1] : vector<8x512xf32> to vector<8xf32>
    %11 = vector.shape_cast %10 : vector<8xf32> to vector<8x1xf32>
    %c0_10 = arith.constant 0 : index
    %c0_11 = arith.constant 0 : index
    %c1 = arith.constant 1 : index
    %12 = vector.load %arg5[%c0_10, %c0_11, %c1] : memref<1x8x2xf32, #tpu.memory_space<vmem>>, vector<1x8x1xf32>
    %13 = vector.shape_cast %12 : vector<1x8x1xf32> to vector<8x1xf32>
    %14 = vector.shape_cast %11 : vector<8x1xf32> to vector<1x8x1xf32>
    tpu.vector_store %arg5[%c0_10, %c0_11, %c1], %14 {strides = array<i32>} : memref<1x8x2xf32, #tpu.memory_space<vmem>>, vector<1x8x1xf32>,
    return
  }
  func.func @transform_0(%arg0: i32, %arg1: i32) -> (i32, i32) {
    %c1_i32 = arith.constant 1 : i32
    %0 = arith.muli %arg0, %c1_i32 : i32
    %1 = arith.addi %0, %arg1 : i32
    %c0_i32 = arith.constant 0 : i32
    %c0_i32_0 = arith.constant 0 : i32
    return %c0_i32, %1 : i32, i32
  }
  func.func @transform_1(%arg0: i32, %arg1: i32) -> (i32, i32) {
    %c0_i32 = arith.constant 0 : i32
    %c0_i32_0 = arith.constant 0 : i32
    %c0_i32_1 = arith.constant 0 : i32
    return %c0_i32, %c0_i32_0 : i32, i32
  }
  func.func @transform_2(%arg0: i32, %arg1: i32) -> (i32, i32) {
    %c1_i32 = arith.constant 1 : i32
    %0 = arith.muli %arg0, %c1_i32 : i32
    %1 = arith.addi %0, %arg1 : i32
    %c0_i32 = arith.constant 0 : i32
    %c0_i32_0 = arith.constant 0 : i32
    return %c0_i32, %1 : i32, i32
  }
  func.func @transform_3(%arg0: i32, %arg1: i32) -> (i32, i32, i32) {
    %c1_i32 = arith.constant 1 : i32
    %0 = arith.muli %arg0, %c1_i32 : i32
    %1 = arith.addi %0, %arg1 : i32
    %c0_i32 = arith.constant 0 : i32
    %c0_i32_0 = arith.constant 0 : i32
    %c0_i32_1 = arith.constant 0 : i32
    return %1, %c0_i32, %c0_i32_0 : i32, i32, i32
  }
}

module attributes {stable_mosaic.version = 11 : i64} {
  func.func @_bn_film_kernel(%arg0: i32, %arg1: i32, %arg2: memref<8x512xf32, #tpu.memory_space<vmem>>, %arg3: memref<1x4x8x1xf32, #tpu.memory_space<vmem>>, %arg4: memref<8x512xf32, #tpu.memory_space<vmem>>) attributes {dimension_semantics = [#tpu.dimension_semantics<parallel>, #tpu.dimension_semantics<parallel>], iteration_bounds = array<i64: 2, 1>, scalar_prefetch = 0 : i64, scratch_operands = 0 : i64, tpu.core_type = #tpu.core_type<tc>, window_params = [{transform_indices = @transform_0, window_bounds = array<i64: 8, 512>}, {transform_indices = @transform_1, window_bounds = array<i64: 1, 4, 8, 1>}, {transform_indices = @transform_2, window_bounds = array<i64: 8, 512>}]} {
    %c0 = arith.constant 0 : index
    %c0_0 = arith.constant 0 : index
    %c0_1 = arith.constant 0 : index
    %c0_2 = arith.constant 0 : index
    %0 = vector.load %arg3[%c0, %c0_0, %c0_1, %c0_2] : memref<1x4x8x1xf32, #tpu.memory_space<vmem>>, vector<1x1x8x1xf32>
    %1 = vector.shape_cast %0 : vector<1x1x8x1xf32> to vector<8x1xf32>
    %c0_3 = arith.constant 0 : index
    %c1 = arith.constant 1 : index
    %c0_4 = arith.constant 0 : index
    %c0_5 = arith.constant 0 : index
    %2 = vector.load %arg3[%c0_3, %c1, %c0_4, %c0_5] : memref<1x4x8x1xf32, #tpu.memory_space<vmem>>, vector<1x1x8x1xf32>
    %3 = vector.shape_cast %2 : vector<1x1x8x1xf32> to vector<8x1xf32>
    %c0_6 = arith.constant 0 : index
    %c2 = arith.constant 2 : index
    %c0_7 = arith.constant 0 : index
    %c0_8 = arith.constant 0 : index
    %4 = vector.load %arg3[%c0_6, %c2, %c0_7, %c0_8] : memref<1x4x8x1xf32, #tpu.memory_space<vmem>>, vector<1x1x8x1xf32>
    %5 = vector.shape_cast %4 : vector<1x1x8x1xf32> to vector<8x1xf32>
    %c0_9 = arith.constant 0 : index
    %c3 = arith.constant 3 : index
    %c0_10 = arith.constant 0 : index
    %c0_11 = arith.constant 0 : index
    %6 = vector.load %arg3[%c0_9, %c3, %c0_10, %c0_11] : memref<1x4x8x1xf32, #tpu.memory_space<vmem>>, vector<1x1x8x1xf32>
    %7 = vector.shape_cast %6 : vector<1x1x8x1xf32> to vector<8x1xf32>
    %c0_12 = arith.constant 0 : index
    %c0_13 = arith.constant 0 : index
    %8 = vector.load %arg2[%c0_12, %c0_13] : memref<8x512xf32, #tpu.memory_space<vmem>>, vector<8x512xf32>
    %9 = vector.broadcast %1 : vector<8x1xf32> to vector<8x512xf32>
    %10 = arith.mulf %8, %9 : vector<8x512xf32>
    %11 = vector.broadcast %3 : vector<8x1xf32> to vector<8x512xf32>
    %12 = arith.addf %10, %11 : vector<8x512xf32>
    %13 = vector.broadcast %5 : vector<8x1xf32> to vector<8x512xf32>
    %14 = arith.mulf %12, %13 : vector<8x512xf32>
    %15 = vector.broadcast %7 : vector<8x1xf32> to vector<8x512xf32>
    %16 = arith.addf %14, %15 : vector<8x512xf32>
    %cst = arith.constant 0.000000e+00 : f32
    %17 = vector.broadcast %cst : f32 to vector<8x512xf32>
    %18 = arith.maximumf %16, %17 : vector<8x512xf32>
    %c0_14 = arith.constant 0 : index
    %c0_15 = arith.constant 0 : index
    %19 = vector.load %arg4[%c0_14, %c0_15] : memref<8x512xf32, #tpu.memory_space<vmem>>, vector<8x512xf32>
    tpu.vector_store %arg4[%c0_14, %c0_15], %18 {strides = array<i32>} : memref<8x512xf32, #tpu.memory_space<vmem>>, vector<8x512xf32>,
    return
  }
  func.func @transform_0(%arg0: i32, %arg1: i32) -> (i32, i32) {
    %c1_i32 = arith.constant 1 : i32
    %0 = arith.muli %arg0, %c1_i32 : i32
    %1 = arith.addi %0, %arg1 : i32
    %c0_i32 = arith.constant 0 : i32
    %c0_i32_0 = arith.constant 0 : i32
    return %c0_i32, %1 : i32, i32
  }
  func.func @transform_1(%arg0: i32, %arg1: i32) -> (i32, i32, i32, i32) {
    %c0_i32 = arith.constant 0 : i32
    %c0_i32_0 = arith.constant 0 : i32
    %c0_i32_1 = arith.constant 0 : i32
    %c0_i32_2 = arith.constant 0 : i32
    return %arg0, %c0_i32, %c0_i32_0, %c0_i32_1 : i32, i32, i32, i32
  }
  func.func @transform_2(%arg0: i32, %arg1: i32) -> (i32, i32) {
    %c1_i32 = arith.constant 1 : i32
    %0 = arith.muli %arg0, %c1_i32 : i32
    %1 = arith.addi %0, %arg1 : i32
    %c0_i32 = arith.constant 0 : i32
    %c0_i32_0 = arith.constant 0 : i32
    return %c0_i32, %1 : i32, i32
  }
}

module attributes {stable_mosaic.version = 11 : i64} {
  func.func @_conv_stats_kernel(%arg0: i32, %arg1: i32, %arg2: memref<256x512xf32, #tpu.memory_space<vmem>>, %arg3: memref<4x256xf32, #tpu.memory_space<vmem>>, %arg4: memref<4x512xf32, #tpu.memory_space<vmem>>, %arg5: memref<1x4x2xf32, #tpu.memory_space<vmem>>) attributes {dimension_semantics = [#tpu.dimension_semantics<parallel>, #tpu.dimension_semantics<parallel>], iteration_bounds = array<i64: 2, 1>, scalar_prefetch = 0 : i64, scratch_operands = 0 : i64, tpu.core_type = #tpu.core_type<tc>, window_params = [{transform_indices = @transform_0, window_bounds = array<i64: 256, 512>}, {pipeline_mode = #tpu.pipeline_mode<synchronous>, transform_indices = @transform_1, window_bounds = array<i64: 4, 256>}, {transform_indices = @transform_2, window_bounds = array<i64: 4, 512>}, {transform_indices = @transform_3, window_bounds = array<i64: 1, 4, 2>}]} {
    %c0 = arith.constant 0 : index
    %c0_0 = arith.constant 0 : index
    %0 = vector.load %arg3[%c0, %c0_0] : memref<4x256xf32, #tpu.memory_space<vmem>>, vector<4x256xf32>
    %c0_1 = arith.constant 0 : index
    %c0_2 = arith.constant 0 : index
    %1 = vector.load %arg2[%c0_1, %c0_2] : memref<256x512xf32, #tpu.memory_space<vmem>>, vector<256x512xf32>
    %cst = arith.constant dense<0.000000e+00> : vector<4x512xf32>
    %2 = tpu.matmul %0, %1, %cst {dimension_numbers = #tpu.dot_dimension_numbers<[1], [0], [0], [1], [0, 0, 1, 1], [], []>} : vector<4x256xf32>, vector<256x512xf32>, vector<4x512xf32> -> vector<4x512xf32>
    %c0_3 = arith.constant 0 : index
    %c0_4 = arith.constant 0 : index
    %3 = vector.load %arg4[%c0_3, %c0_4] : memref<4x512xf32, #tpu.memory_space<vmem>>, vector<4x512xf32>
    tpu.vector_store %arg4[%c0_3, %c0_4], %2 {strides = array<i32>} : memref<4x512xf32, #tpu.memory_space<vmem>>, vector<4x512xf32>,
    %cst_5 = arith.constant dense<0.000000e+00> : vector<4xf32>
    %4 = vector.multi_reduction <add>, %2, %cst_5 [1] : vector<4x512xf32> to vector<4xf32>
    %5 = vector.shape_cast %4 : vector<4xf32> to vector<4x1xf32>
    %c0_6 = arith.constant 0 : index
    %c0_7 = arith.constant 0 : index
    %c0_8 = arith.constant 0 : index
    %6 = vector.load %arg5[%c0_6, %c0_7, %c0_8] : memref<1x4x2xf32, #tpu.memory_space<vmem>>, vector<1x4x1xf32>
    %7 = vector.shape_cast %6 : vector<1x4x1xf32> to vector<4x1xf32>
    %8 = vector.shape_cast %5 : vector<4x1xf32> to vector<1x4x1xf32>
    tpu.vector_store %arg5[%c0_6, %c0_7, %c0_8], %8 {strides = array<i32>} : memref<1x4x2xf32, #tpu.memory_space<vmem>>, vector<1x4x1xf32>,
    %9 = arith.mulf %2, %2 : vector<4x512xf32>
    %cst_9 = arith.constant dense<0.000000e+00> : vector<4xf32>
    %10 = vector.multi_reduction <add>, %9, %cst_9 [1] : vector<4x512xf32> to vector<4xf32>
    %11 = vector.shape_cast %10 : vector<4xf32> to vector<4x1xf32>
    %c0_10 = arith.constant 0 : index
    %c0_11 = arith.constant 0 : index
    %c1 = arith.constant 1 : index
    %12 = vector.load %arg5[%c0_10, %c0_11, %c1] : memref<1x4x2xf32, #tpu.memory_space<vmem>>, vector<1x4x1xf32>
    %13 = vector.shape_cast %12 : vector<1x4x1xf32> to vector<4x1xf32>
    %14 = vector.shape_cast %11 : vector<4x1xf32> to vector<1x4x1xf32>
    tpu.vector_store %arg5[%c0_10, %c0_11, %c1], %14 {strides = array<i32>} : memref<1x4x2xf32, #tpu.memory_space<vmem>>, vector<1x4x1xf32>,
    return
  }
  func.func @transform_0(%arg0: i32, %arg1: i32) -> (i32, i32) {
    %c1_i32 = arith.constant 1 : i32
    %0 = arith.muli %arg0, %c1_i32 : i32
    %1 = arith.addi %0, %arg1 : i32
    %c0_i32 = arith.constant 0 : i32
    %c0_i32_0 = arith.constant 0 : i32
    return %c0_i32, %1 : i32, i32
  }
  func.func @transform_1(%arg0: i32, %arg1: i32) -> (i32, i32) {
    %c0_i32 = arith.constant 0 : i32
    %c0_i32_0 = arith.constant 0 : i32
    %c0_i32_1 = arith.constant 0 : i32
    return %c0_i32, %c0_i32_0 : i32, i32
  }
  func.func @transform_2(%arg0: i32, %arg1: i32) -> (i32, i32) {
    %c1_i32 = arith.constant 1 : i32
    %0 = arith.muli %arg0, %c1_i32 : i32
    %1 = arith.addi %0, %arg1 : i32
    %c0_i32 = arith.constant 0 : i32
    %c0_i32_0 = arith.constant 0 : i32
    return %c0_i32, %1 : i32, i32
  }
  func.func @transform_3(%arg0: i32, %arg1: i32) -> (i32, i32, i32) {
    %c1_i32 = arith.constant 1 : i32
    %0 = arith.muli %arg0, %c1_i32 : i32
    %1 = arith.addi %0, %arg1 : i32
    %c0_i32 = arith.constant 0 : i32
    %c0_i32_0 = arith.constant 0 : i32
    %c0_i32_1 = arith.constant 0 : i32
    return %1, %c0_i32, %c0_i32_0 : i32, i32, i32
  }
}

module attributes {stable_mosaic.version = 11 : i64} {
  func.func @_bn_film_kernel(%arg0: i32, %arg1: i32, %arg2: memref<4x512xf32, #tpu.memory_space<vmem>>, %arg3: memref<1x4x4x1xf32, #tpu.memory_space<vmem>>, %arg4: memref<4x512xf32, #tpu.memory_space<vmem>>) attributes {dimension_semantics = [#tpu.dimension_semantics<parallel>, #tpu.dimension_semantics<parallel>], iteration_bounds = array<i64: 2, 1>, scalar_prefetch = 0 : i64, scratch_operands = 0 : i64, tpu.core_type = #tpu.core_type<tc>, window_params = [{transform_indices = @transform_0, window_bounds = array<i64: 4, 512>}, {transform_indices = @transform_1, window_bounds = array<i64: 1, 4, 4, 1>}, {transform_indices = @transform_2, window_bounds = array<i64: 4, 512>}]} {
    %c0 = arith.constant 0 : index
    %c0_0 = arith.constant 0 : index
    %c0_1 = arith.constant 0 : index
    %c0_2 = arith.constant 0 : index
    %0 = vector.load %arg3[%c0, %c0_0, %c0_1, %c0_2] : memref<1x4x4x1xf32, #tpu.memory_space<vmem>>, vector<1x1x4x1xf32>
    %1 = vector.shape_cast %0 : vector<1x1x4x1xf32> to vector<4x1xf32>
    %c0_3 = arith.constant 0 : index
    %c1 = arith.constant 1 : index
    %c0_4 = arith.constant 0 : index
    %c0_5 = arith.constant 0 : index
    %2 = vector.load %arg3[%c0_3, %c1, %c0_4, %c0_5] : memref<1x4x4x1xf32, #tpu.memory_space<vmem>>, vector<1x1x4x1xf32>
    %3 = vector.shape_cast %2 : vector<1x1x4x1xf32> to vector<4x1xf32>
    %c0_6 = arith.constant 0 : index
    %c2 = arith.constant 2 : index
    %c0_7 = arith.constant 0 : index
    %c0_8 = arith.constant 0 : index
    %4 = vector.load %arg3[%c0_6, %c2, %c0_7, %c0_8] : memref<1x4x4x1xf32, #tpu.memory_space<vmem>>, vector<1x1x4x1xf32>
    %5 = vector.shape_cast %4 : vector<1x1x4x1xf32> to vector<4x1xf32>
    %c0_9 = arith.constant 0 : index
    %c3 = arith.constant 3 : index
    %c0_10 = arith.constant 0 : index
    %c0_11 = arith.constant 0 : index
    %6 = vector.load %arg3[%c0_9, %c3, %c0_10, %c0_11] : memref<1x4x4x1xf32, #tpu.memory_space<vmem>>, vector<1x1x4x1xf32>
    %7 = vector.shape_cast %6 : vector<1x1x4x1xf32> to vector<4x1xf32>
    %c0_12 = arith.constant 0 : index
    %c0_13 = arith.constant 0 : index
    %8 = vector.load %arg2[%c0_12, %c0_13] : memref<4x512xf32, #tpu.memory_space<vmem>>, vector<4x512xf32>
    %9 = vector.broadcast %1 : vector<4x1xf32> to vector<4x512xf32>
    %10 = arith.mulf %8, %9 : vector<4x512xf32>
    %11 = vector.broadcast %3 : vector<4x1xf32> to vector<4x512xf32>
    %12 = arith.addf %10, %11 : vector<4x512xf32>
    %cst = arith.constant 0.000000e+00 : f32
    %13 = vector.broadcast %cst : f32 to vector<4x512xf32>
    %14 = arith.maximumf %12, %13 : vector<4x512xf32>
    %15 = vector.broadcast %5 : vector<4x1xf32> to vector<4x512xf32>
    %16 = arith.mulf %14, %15 : vector<4x512xf32>
    %17 = vector.broadcast %7 : vector<4x1xf32> to vector<4x512xf32>
    %18 = arith.addf %16, %17 : vector<4x512xf32>
    %c0_14 = arith.constant 0 : index
    %c0_15 = arith.constant 0 : index
    %19 = vector.load %arg4[%c0_14, %c0_15] : memref<4x512xf32, #tpu.memory_space<vmem>>, vector<4x512xf32>
    tpu.vector_store %arg4[%c0_14, %c0_15], %18 {strides = array<i32>} : memref<4x512xf32, #tpu.memory_space<vmem>>, vector<4x512xf32>,
    return
  }
  func.func @transform_0(%arg0: i32, %arg1: i32) -> (i32, i32) {
    %c1_i32 = arith.constant 1 : i32
    %0 = arith.muli %arg0, %c1_i32 : i32
    %1 = arith.addi %0, %arg1 : i32
    %c0_i32 = arith.constant 0 : i32
    %c0_i32_0 = arith.constant 0 : i32
    return %c0_i32, %1 : i32, i32
  }
  func.func @transform_1(%arg0: i32, %arg1: i32) -> (i32, i32, i32, i32) {
    %c0_i32 = arith.constant 0 : i32
    %c0_i32_0 = arith.constant 0 : i32
    %c0_i32_1 = arith.constant 0 : i32
    %c0_i32_2 = arith.constant 0 : i32
    return %arg0, %c0_i32, %c0_i32_0, %c0_i32_1 : i32, i32, i32, i32
  }
  func.func @transform_2(%arg0: i32, %arg1: i32) -> (i32, i32) {
    %c1_i32 = arith.constant 1 : i32
    %0 = arith.muli %arg0, %c1_i32 : i32
    %1 = arith.addi %0, %arg1 : i32
    %c0_i32 = arith.constant 0 : i32
    %c0_i32_0 = arith.constant 0 : i32
    return %c0_i32, %1 : i32, i32
  }
}

</mosaic_0001>

<bundles_post_ra>
// kernel: mid_blocks_forward.4
= control target key start
LH: loop header
LB: loop body
LE: loop exit
PB: predicated region body
PF: predicated region fallthrough
CT: control target
= control target key end

     0   :  { %s811_s12 = smov 0   ;;  %s813_s13 = smov 0   ;;  %s1082_s0 = inlined_call_operand.vmem [shape: f32[128,1024], index: 0, kind: input, shape index: {}]   ;;  %s1083_s1 = inlined_call_operand.vmem [shape: f32[8,128], index: 1, kind: input, shape index: {}]   ;;  %s1084_s2 = inlined_call_operand.vmem [shape: f32[8,1024], index: 2, kind: output, shape index: {0}]   ;;  %s1085_s3 = inlined_call_operand.vmem [shape: f32[2,8,2], index: 3, kind: output, shape index: {1}]  }
   0x1   :  { %s815_s14 = smov 0   ;;  %s817_s15 = smov 0  }
   0x2   :  { %s819_s16 = smov 0  }
   0x3 LB: > { %s26_s17 = sadd.s32 1, %s784_s15  ;;  %p42_p1 = scmp.ne.s32.totalorder %s776_s13, %s772_s12  ;;  %s788_s16 = sphi %s819_s16, %s14_s16   ;;  %s784_s15 = sphi %s817_s15, %s1089_s15   ;;  %s780_s14 = sphi %s815_s14, %s1088_s14   ;;  %s776_s13 = sphi %s813_s13, %s1087_s13   ;;  %s772_s12 = sphi %s811_s12, %s1086_s12  }
   0x4   : > { %p28_p0 = scmp.ge.s32.totalorder %s26_s17, 2  ;;  %p43_p2 = scmp.eq.s32.totalorder %s788_s16, 0 }
   0x5   : > { %s35_s19 = sadd.s32 1, %s776_s13  ;;  %p697_p5 = scmp.ge.s32.totalorder %s788_s16, 2 }
   0x6   : > { %s1091_s17 = smov (%p28_p0, %s26_s17), 0  ;;  %p44_p3 = por %p43_p2, %p42_p1 }
   0x7   : > { %s32_s18 = ssub.s32 %s784_s15, %s1091_s17  ;;  %148 = sbr.rel (%p697_p5) target bundleno = 48 (0x30), region = 20 }
   0x8   : > { %p33_p4 = scmp.eq.s32.totalorder %s32_s18, 0 }
   0xa   : > { %s846_s20 = scalar_select %p33_p4, %s776_s13, %s35_s19  }
   0xc   : > { %151 = sbr.rel (!%p44_p3) target bundleno = 48 (0x30), region = 24  ;;  %s153_s21 = sand.u32 (%p44_p3), 1, %s776_s13  }
   0xd   : > { %s708_s22 = sshll.u32 (%p44_p3), %s784_s15, 5  ;;  %s698_s23 = sshll.u32 (%p44_p3), %s153_s21, 9 }
   0xe   : > { %s854_s26 = scalar_lea.vmem (%p44_p3), %s1082_s0, %s708_s22  ;;  %s859_s27 = scalar_lea.vmem (%p44_p3), [#allocation2], %s698_s23 }
   0xf   : > { %v172_v0 = vld [vmem:[%s854_s26] sm:$0xff] (%p44_p3)  ;;  %v174_v1 = vld [vmem:[%s854_s26 + $0x8] sm:$0xff] (%p44_p3)  ;;  %v176_v2 = vld [vmem:[%s854_s26 + $0x10] sm:$0xff] (%p44_p3) }
  0x10   : > { %173 = vst [vmem:[%s859_s27] sm:$0xff] (%p44_p3), %v172_v0  ;;  %175 = vst [vmem:[%s859_s27 + $0x8] sm:$0xff] (%p44_p3), %v174_v1  ;;  %v178_v3 = vld [vmem:[%s854_s26 + $0x18] sm:$0xff] (%p44_p3)  ;;  %v180_v4 = vld [vmem:[%s854_s26 + $0x40] sm:$0xff] (%p44_p3) }
  0x11   : > { %177 = vst [vmem:[%s859_s27 + $0x10] sm:$0xff] %v176_v2  ;;  %v182_v5 = vld [vmem:[%s854_s26 + $0x48] sm:$0xff]  ;;  %179 = vst [vmem:[%s859_s27 + $0x18] sm:$0xff] %v178_v3  ;;  %v184_v6 = vld [vmem:[%s854_s26 + $0x50] sm:$0xff] }
  0x12   : > { %181 = vst [vmem:[%s859_s27 + $0x20] sm:$0xff] %v180_v4  ;;  %183 = vst [vmem:[%s859_s27 + $0x28] sm:$0xff] %v182_v5  ;;  %v186_v7 = vld [vmem:[%s854_s26 + $0x58] sm:$0xff]  ;;  %v188_v8 = vld [vmem:[%s854_s26 + $0x80] sm:$0xff] }
  0x13   : > { %185 = vst [vmem:[%s859_s27 + $0x30] sm:$0xff] %v184_v6  ;;  %187 = vst [vmem:[%s859_s27 + $0x38] sm:$0xff] %v186_v7  ;;  %v190_v9 = vld [vmem:[%s854_s26 + $0x88] sm:$0xff]  ;;  %v192_v10 = vld [vmem:[%s854_s26 + $0x90] sm:$0xff] }
  0x14   : > { %189 = vst [vmem:[%s859_s27 + $0x40] sm:$0xff] %v188_v8  ;;  %v194_v11 = vld [vmem:[%s854_s26 + $0x98] sm:$0xff]  ;;  %191 = vst [vmem:[%s859_s27 + $0x48] sm:$0xff] %v190_v9  ;;  %v196_v12 = vld [vmem:[%s854_s26 + $0xc0] sm:$0xff] }
  0x15   : > { %193 = vst [vmem:[%s859_s27 + $0x50] sm:$0xff] %v192_v10  ;;  %195 = vst [vmem:[%s859_s27 + $0x58] sm:$0xff] %v194_v11  ;;  %v198_v13 = vld [vmem:[%s854_s26 + $0xc8] sm:$0xff]  ;;  %v200_v14 = vld [vmem:[%s854_s26 + $0xd0] sm:$0xff] }
  0x16   : > { %197 = vst [vmem:[%s859_s27 + $0x60] sm:$0xff] %v196_v12  ;;  %199 = vst [vmem:[%s859_s27 + $0x68] sm:$0xff] %v198_v13  ;;  %v202_v15 = vld [vmem:[%s854_s26 + $0xd8] sm:$0xff]  ;;  %v204_v16 = vld [vmem:[%s854_s26 + $0x100] sm:$0xff] }
  0x17   : > { %201 = vst [vmem:[%s859_s27 + $0x70] sm:$0xff] %v200_v14  ;;  %v206_v17 = vld [vmem:[%s854_s26 + $0x108] sm:$0xff]  ;;  %203 = vst [vmem:[%s859_s27 + $0x78] sm:$0xff] %v202_v15  ;;  %v208_v18 = vld [vmem:[%s854_s26 + $0x110] sm:$0xff] }
  0x18   : > { %205 = vst [vmem:[%s859_s27 + $0x80] sm:$0xff] %v204_v16  ;;  %207 = vst [vmem:[%s859_s27 + $0x88] sm:$0xff] %v206_v17  ;;  %v210_v19 = vld [vmem:[%s854_s26 + $0x118] sm:$0xff]  ;;  %v212_v20 = vld [vmem:[%s854_s26 + $0x140] sm:$0xff] }
  0x19   : > { %209 = vst [vmem:[%s859_s27 + $0x90] sm:$0xff] %v208_v18  ;;  %211 = vst [vmem:[%s859_s27 + $0x98] sm:$0xff] %v210_v19  ;;  %v214_v21 = vld [vmem:[%s854_s26 + $0x148] sm:$0xff]  ;;  %v216_v22 = vld [vmem:[%s854_s26 + $0x150] sm:$0xff] }
  0x1a   : > { %213 = vst [vmem:[%s859_s27 + $0xa0] sm:$0xff] %v212_v20  ;;  %v218_v23 = vld [vmem:[%s854_s26 + $0x158] sm:$0xff]  ;;  %215 = vst [vmem:[%s859_s27 + $0xa8] sm:$0xff] %v214_v21  ;;  %v220_v24 = vld [vmem:[%s854_s26 + $0x180] sm:$0xff] }
  0x1b   : > { %217 = vst [vmem:[%s859_s27 + $0xb0] sm:$0xff] %v216_v22  ;;  %219 = vst [vmem:[%s859_s27 + $0xb8] sm:$0xff] %v218_v23  ;;  %v222_v25 = vld [vmem:[%s854_s26 + $0x188] sm:$0xff]  ;;  %v224_v26 = vld [vmem:[%s854_s26 + $0x190] sm:$0xff] }
  0x1c   : > { %221 = vst [vmem:[%s859_s27 + $0xc0] sm:$0xff] %v220_v24  ;;  %223 = vst [vmem:[%s859_s27 + $0xc8] sm:$0xff] %v222_v25  ;;  %v226_v27 = vld [vmem:[%s854_s26 + $0x198] sm:$0xff]  ;;  %v228_v28 = vld [vmem:[%s854_s26 + $0x1c0] sm:$0xff] }
  0x1d   : > { %225 = vst [vmem:[%s859_s27 + $0xd0] sm:$0xff] %v224_v26  ;;  %v230_v29 = vld [vmem:[%s854_s26 + $0x1c8] sm:$0xff]  ;;  %227 = vst [vmem:[%s859_s27 + $0xd8] sm:$0xff] %v226_v27  ;;  %v232_v30 = vld [vmem:[%s854_s26 + $0x1d0] sm:$0xff] }
  0x1e   : > { %229 = vst [vmem:[%s859_s27 + $0xe0] sm:$0xff] %v228_v28  ;;  %231 = vst [vmem:[%s859_s27 + $0xe8] sm:$0xff] %v230_v29  ;;  %v234_v31 = vld [vmem:[%s854_s26 + $0x1d8] sm:$0xff]  ;;  %v236_v32 = vld [vmem:[%s854_s26 + $0x200] sm:$0xff] }
  0x1f   : > { %233 = vst [vmem:[%s859_s27 + $0xf0] sm:$0xff] %v232_v30  ;;  %235 = vst [vmem:[%s859_s27 + $0xf8] sm:$0xff] %v234_v31  ;;  %v238_v33 = vld [vmem:[%s854_s26 + $0x208] sm:$0xff]  ;;  %v240_v34 = vld [vmem:[%s854_s26 + $0x210] sm:$0xff] }
  0x20   : > { %237 = vst [vmem:[%s859_s27 + $0x100] sm:$0xff] %v236_v32  ;;  %v242_v35 = vld [vmem:[%s854_s26 + $0x218] sm:$0xff]  ;;  %239 = vst [vmem:[%s859_s27 + $0x108] sm:$0xff] %v238_v33  ;;  %v244_v36 = vld [vmem:[%s854_s26 + $0x240] sm:$0xff] }
  0x21   : > { %241 = vst [vmem:[%s859_s27 + $0x110] sm:$0xff] %v240_v34  ;;  %243 = vst [vmem:[%s859_s27 + $0x118] sm:$0xff] %v242_v35  ;;  %v246_v37 = vld [vmem:[%s854_s26 + $0x248] sm:$0xff]  ;;  %v248_v38 = vld [vmem:[%s854_s26 + $0x250] sm:$0xff] }
  0x22   : > { %245 = vst [vmem:[%s859_s27 + $0x120] sm:$0xff] %v244_v36  ;;  %247 = vst [vmem:[%s859_s27 + $0x128] sm:$0xff] %v246_v37  ;;  %v250_v39 = vld [vmem:[%s854_s26 + $0x258] sm:$0xff]  ;;  %v252_v40 = vld [vmem:[%s854_s26 + $0x280] sm:$0xff] }
  0x23   : > { %249 = vst [vmem:[%s859_s27 + $0x130] sm:$0xff] %v248_v38  ;;  %v254_v41 = vld [vmem:[%s854_s26 + $0x288] sm:$0xff]  ;;  %251 = vst [vmem:[%s859_s27 + $0x138] sm:$0xff] %v250_v39  ;;  %v256_v42 = vld [vmem:[%s854_s26 + $0x290] sm:$0xff] }
  0x24   : > { %253 = vst [vmem:[%s859_s27 + $0x140] sm:$0xff] %v252_v40  ;;  %255 = vst [vmem:[%s859_s27 + $0x148] sm:$0xff] %v254_v41  ;;  %v258_v43 = vld [vmem:[%s854_s26 + $0x298] sm:$0xff]  ;;  %v260_v44 = vld [vmem:[%s854_s26 + $0x2c0] sm:$0xff] }
  0x25   : > { %257 = vst [vmem:[%s859_s27 + $0x150] sm:$0xff] %v256_v42  ;;  %259 = vst [vmem:[%s859_s27 + $0x158] sm:$0xff] %v258_v43  ;;  %v262_v45 = vld [vmem:[%s854_s26 + $0x2c8] sm:$0xff]  ;;  %v264_v46 = vld [vmem:[%s854_s26 + $0x2d0] sm:$0xff] }
  0x26   : > { %261 = vst [vmem:[%s859_s27 + $0x160] sm:$0xff] %v260_v44  ;;  %v266_v47 = vld [vmem:[%s854_s26 + $0x2d8] sm:$0xff]  ;;  %263 = vst [vmem:[%s859_s27 + $0x168] sm:$0xff] %v262_v45  ;;  %v268_v48 = vld [vmem:[%s854_s26 + $0x300] sm:$0xff] }
  0x27   : > { %265 = vst [vmem:[%s859_s27 + $0x170] sm:$0xff] %v264_v46  ;;  %267 = vst [vmem:[%s859_s27 + $0x178] sm:$0xff] %v266_v47  ;;  %v270_v49 = vld [vmem:[%s854_s26 + $0x308] sm:$0xff]  ;;  %v272_v50 = vld [vmem:[%s854_s26 + $0x310] sm:$0xff] }
  0x28   : > { %269 = vst [vmem:[%s859_s27 + $0x180] sm:$0xff] %v268_v48  ;;  %271 = vst [vmem:[%s859_s27 + $0x188] sm:$0xff] %v270_v49  ;;  %v274_v51 = vld [vmem:[%s854_s26 + $0x318] sm:$0xff]  ;;  %v276_v52 = vld [vmem:[%s854_s26 + $0x340] sm:$0xff] }
  0x29   : > { %273 = vst [vmem:[%s859_s27 + $0x190] sm:$0xff] %v272_v50  ;;  %v278_v53 = vld [vmem:[%s854_s26 + $0x348] sm:$0xff]  ;;  %275 = vst [vmem:[%s859_s27 + $0x198] sm:$0xff] %v274_v51  ;;  %v280_v54 = vld [vmem:[%s854_s26 + $0x350] sm:$0xff] }
  0x2a   : > { %277 = vst [vmem:[%s859_s27 + $0x1a0] sm:$0xff] %v276_v52  ;;  %279 = vst [vmem:[%s859_s27 + $0x1a8] sm:$0xff] %v278_v53  ;;  %v282_v55 = vld [vmem:[%s854_s26 + $0x358] sm:$0xff]  ;;  %v284_v56 = vld [vmem:[%s854_s26 + $0x380] sm:$0xff] }
  0x2b   : > { %281 = vst [vmem:[%s859_s27 + $0x1b0] sm:$0xff] %v280_v54  ;;  %283 = vst [vmem:[%s859_s27 + $0x1b8] sm:$0xff] %v282_v55  ;;  %v286_v57 = vld [vmem:[%s854_s26 + $0x388] sm:$0xff]  ;;  %v288_v58 = vld [vmem:[%s854_s26 + $0x390] sm:$0xff] }
  0x2c   : > { %285 = vst [vmem:[%s859_s27 + $0x1c0] sm:$0xff] %v284_v56  ;;  %v290_v59 = vld [vmem:[%s854_s26 + $0x398] sm:$0xff]  ;;  %287 = vst [vmem:[%s859_s27 + $0x1c8] sm:$0xff] %v286_v57  ;;  %v292_v60 = vld [vmem:[%s854_s26 + $0x3c0] sm:$0xff] }
  0x2d   : > { %289 = vst [vmem:[%s859_s27 + $0x1d0] sm:$0xff] %v288_v58  ;;  %291 = vst [vmem:[%s859_s27 + $0x1d8] sm:$0xff] %v290_v59  ;;  %v294_v61 = vld [vmem:[%s854_s26 + $0x3c8] sm:$0xff]  ;;  %v296_v62 = vld [vmem:[%s854_s26 + $0x3d0] sm:$0xff] }
  0x2e   : > { %293 = vst [vmem:[%s859_s27 + $0x1e0] sm:$0xff] %v292_v60  ;;  %295 = vst [vmem:[%s859_s27 + $0x1e8] sm:$0xff] %v294_v61  ;;  %v298_v63 = vld [vmem:[%s854_s26 + $0x3d8] sm:$0xff] }
  0x2f   : > { %297 = vst [vmem:[%s859_s27 + $0x1f0] sm:$0xff] %v296_v62  ;;  %299 = vst [vmem:[%s859_s27 + $0x1f8] sm:$0xff] %v298_v63 }
  0x30 PF: > { %p701_p6 = scmp.ge.s32.totalorder %s788_s16, 1  ;;  %p304_p7 = scmp.lt.s32.totalorder %s788_s16, 3 }
  0x32   : > { %p305_p8 = pnand %p701_p6, %p304_p7 }
  0x33   : > { %s311_s28 = sand.u32 (!%p305_p8), 1, %s772_s12   ;;  %s703_s6 = sshll.u32 (!%p305_p8), %s780_s14, 2 }
  0x34   : > { %308 = sbr.rel (%p305_p8) target bundleno = 435 (0x1b3), region = 47  ;;  %s702_s29 = sshll.u32 (!%p305_p8), %s311_s28, 9 }
  0x35   : > { %s989_s30 = scalar_lea.vmem (!%p305_p8), [#allocation2], %s702_s29  ;;  %p344_p9 = scmp.lt.s32.totalorder (!%p305_p8), %s703_s6, 7 }
  0x36   : > { %p351_p10 = scmp.lt.s32.totalorder (!%p305_p8), %s780_s14, 1 }
  0x39   : > { %v790_v0 = vmov 0.0   ;;  %v418_v1 = vld [vmem:[%s989_s30 + $0x1e8] sm:$0xff]  ;;  %v417_v2 = vld [vmem:[%s989_s30 + $0x1e0] sm:$0xff]  ;;  %v420_v4 = vld [vmem:[%s989_s30 + $0x1f8] sm:$0xff]  ;;  %s1093_s6 = smov (!%p344_p9, %s703_s6), 7  ;;  %s1095_s14 = smov (!%p351_p10, %s780_s14), 1 }
  0x3a   : > { %485 = vmatprep.mubr.f32.mxu0 %v790_v0  ;;  %556 = vmatprep.mubr.f32.mxu1 %v790_v0  ;;  %v414_v3 = vld [vmem:[%s989_s30 + $0x1c8] sm:$0xff]  ;;  %v413_v5 = vld [vmem:[%s989_s30 + $0x1c0] sm:$0xff]  ;;  %v419_v6 = vld [vmem:[%s989_s30 + $0x1f0] sm:$0xff]  ;;  %s704_s7 = sshll.u32 %s1093_s6, 3  ;;  %s705_s11 = sshll.u32 %s1095_s14, 3  ;;  %vm572_vm0 = vcmask 7168  }
  0x3b   : > { %421 = vmatprep.subr.mxu0 %v418_v1  ;;  %492 = vmatprep.subr.mxu1 %v420_v4  ;;  %v410_v7 = vld [vmem:[%s989_s30 + $0x1a8] sm:$0xff]  ;;  %v416_v8 = vld [vmem:[%s989_s30 + $0x1d8] sm:$0xff]  ;;  %v409_v9 = vld [vmem:[%s989_s30 + $0x1a0] sm:$0xff]  ;;  %s347_s10 = scalar_lea.vmem %s1084_s2, %s704_s7  ;;  %s354_s19 = scalar_lea.vmem %s1085_s3, %s705_s11  ;;  %vm583_vm1 = vcmask 15368  }
  0x3c   : > { %422 = vmatpush1.msra.mxu0 %v417_v2  ;;  %493 = vmatpush1.msra.mxu1 %v419_v6  ;;  %v415_v10 = vld [vmem:[%s989_s30 + $0x1d0] sm:$0xff]  ;;  %v412_v11 = vld [vmem:[%s989_s30 + $0x1b8] sm:$0xff]  ;;  %v406_v12 = vld [vmem:[%s989_s30 + $0x188] sm:$0xff] }
  0x3d   : > { %423 = vmatprep.subr.mxu0 %v414_v3  ;;  %494 = vmatprep.subr.mxu1 %v416_v8  ;;  %v411_v13 = vld [vmem:[%s989_s30 + $0x1b0] sm:$0xff]  ;;  %v405_v14 = vld [vmem:[%s989_s30 + $0x180] sm:$0xff]  ;;  %v408_v15 = vld [vmem:[%s989_s30 + $0x198] sm:$0xff] }
  0x3e   : > { %424 = vmatpush1.msra.mxu0 %v413_v5  ;;  %495 = vmatpush1.msra.mxu1 %v415_v10  ;;  %v402_v16 = vld [vmem:[%s989_s30 + $0x168] sm:$0xff]  ;;  %v407_v17 = vld [vmem:[%s989_s30 + $0x190] sm:$0xff]  ;;  %v401_v18 = vld [vmem:[%s989_s30 + $0x160] sm:$0xff] }
  0x3f   : > { %425 = vmatprep.subr.mxu0 %v410_v7  ;;  %496 = vmatprep.subr.mxu1 %v412_v11  ;;  %v404_v19 = vld [vmem:[%s989_s30 + $0x178] sm:$0xff]  ;;  %v398_v20 = vld [vmem:[%s989_s30 + $0x148] sm:$0xff]  ;;  %v403_v21 = vld [vmem:[%s989_s30 + $0x170] sm:$0xff] }
  0x40   : > { %426 = vmatpush1.msra.mxu0 %v409_v9  ;;  %497 = vmatpush1.msra.mxu1 %v411_v13  ;;  %v397_v22 = vld [vmem:[%s989_s30 + $0x140] sm:$0xff]  ;;  %v400_v23 = vld [vmem:[%s989_s30 + $0x158] sm:$0xff]  ;;  %v394_v24 = vld [vmem:[%s989_s30 + $0x128] sm:$0xff] }
  0x41   : > { %427 = vmatprep.subr.mxu0 %v406_v12  ;;  %498 = vmatprep.subr.mxu1 %v408_v15  ;;  %v399_v25 = vld [vmem:[%s989_s30 + $0x150] sm:$0xff]  ;;  %v393_v26 = vld [vmem:[%s989_s30 + $0x120] sm:$0xff]  ;;  %v396_v27 = vld [vmem:[%s989_s30 + $0x138] sm:$0xff] }
  0x42   : > { %428 = vmatpush1.msra.mxu0 %v405_v14  ;;  %499 = vmatpush1.msra.mxu1 %v407_v17  ;;  %v390_v28 = vld [vmem:[%s989_s30 + $0x108] sm:$0xff]  ;;  %v395_v29 = vld [vmem:[%s989_s30 + $0x130] sm:$0xff]  ;;  %v389_v30 = vld [vmem:[%s989_s30 + $0x100] sm:$0xff] }
  0x43   : > { %429 = vmatprep.subr.mxu0 %v402_v16  ;;  %500 = vmatprep.subr.mxu1 %v404_v19  ;;  %v392_v31 = vld [vmem:[%s989_s30 + $0x118] sm:$0xff]  ;;  %v386_v32 = vld [vmem:[%s989_s30 + $0xe8] sm:$0xff]  ;;  %v391_v33 = vld [vmem:[%s989_s30 + $0x110] sm:$0xff] }
  0x44   : > { %430 = vmatpush1.msra.mxu0 %v401_v18  ;;  %501 = vmatpush1.msra.mxu1 %v403_v21  ;;  %v385_v34 = vld [vmem:[%s989_s30 + $0xe0] sm:$0xff]  ;;  %v388_v35 = vld [vmem:[%s989_s30 + $0xf8] sm:$0xff]  ;;  %v382_v36 = vld [vmem:[%s989_s30 + $0xc8] sm:$0xff] }
  0x45   : > { %431 = vmatprep.subr.mxu0 %v398_v20  ;;  %502 = vmatprep.subr.mxu1 %v400_v23  ;;  %v387_v37 = vld [vmem:[%s989_s30 + $0xf0] sm:$0xff]  ;;  %v381_v38 = vld [vmem:[%s989_s30 + $0xc0] sm:$0xff]  ;;  %v384_v39 = vld [vmem:[%s989_s30 + $0xd8] sm:$0xff] }
  0x46   : > { %432 = vmatpush1.msra.mxu0 %v397_v22  ;;  %503 = vmatpush1.msra.mxu1 %v399_v25  ;;  %v378_v40 = vld [vmem:[%s989_s30 + $0xa8] sm:$0xff]  ;;  %v383_v41 = vld [vmem:[%s989_s30 + $0xd0] sm:$0xff]  ;;  %v377_v42 = vld [vmem:[%s989_s30 + $0xa0] sm:$0xff] }
  0x47   : > { %433 = vmatprep.subr.mxu0 %v394_v24  ;;  %504 = vmatprep.subr.mxu1 %v396_v27  ;;  %v380_v43 = vld [vmem:[%s989_s30 + $0xb8] sm:$0xff]  ;;  %v374_v44 = vld [vmem:[%s989_s30 + $0x88] sm:$0xff]  ;;  %v379_v45 = vld [vmem:[%s989_s30 + $0xb0] sm:$0xff] }
  0x48   : > { %434 = vmatpush1.msra.mxu0 %v393_v26  ;;  %505 = vmatpush1.msra.mxu1 %v395_v29  ;;  %v373_v46 = vld [vmem:[%s989_s30 + $0x80] sm:$0xff]  ;;  %v376_v47 = vld [vmem:[%s989_s30 + $0x98] sm:$0xff]  ;;  %v370_v48 = vld [vmem:[%s989_s30 + $0x68] sm:$0xff] }
  0x49   : > { %435 = vmatprep.subr.mxu0 %v390_v28  ;;  %506 = vmatprep.subr.mxu1 %v392_v31  ;;  %v375_v49 = vld [vmem:[%s989_s30 + $0x90] sm:$0xff]  ;;  %v369_v50 = vld [vmem:[%s989_s30 + $0x60] sm:$0xff]  ;;  %v372_v51 = vld [vmem:[%s989_s30 + $0x78] sm:$0xff] }
  0x4a   : > { %436 = vmatpush1.msra.mxu0 %v389_v30  ;;  %507 = vmatpush1.msra.mxu1 %v391_v33  ;;  %v366_v52 = vld [vmem:[%s989_s30 + $0x48] sm:$0xff]  ;;  %v371_v53 = vld [vmem:[%s989_s30 + $0x70] sm:$0xff]  ;;  %v365_v54 = vld [vmem:[%s989_s30 + $0x40] sm:$0xff] }
  0x4b   : > { %437 = vmatprep.subr.mxu0 %v386_v32  ;;  %508 = vmatprep.subr.mxu1 %v388_v35  ;;  %v368_v55 = vld [vmem:[%s989_s30 + $0x58] sm:$0xff]  ;;  %v362_v56 = vld [vmem:[%s989_s30 + $0x28] sm:$0xff]  ;;  %v367_v57 = vld [vmem:[%s989_s30 + $0x50] sm:$0xff] }
  0x4c   : > { %438 = vmatpush1.msra.mxu0 %v385_v34  ;;  %509 = vmatpush1.msra.mxu1 %v387_v37  ;;  %v361_v58 = vld [vmem:[%s989_s30 + $0x20] sm:$0xff]  ;;  %v364_v59 = vld [vmem:[%s989_s30 + $0x38] sm:$0xff]  ;;  %v358_v60 = vld [vmem:[%s989_s30 + $0x8] sm:$0xff] }
  0x4d   : > { %439 = vmatprep.subr.mxu0 %v382_v36  ;;  %510 = vmatprep.subr.mxu1 %v384_v39  ;;  %v363_v61 = vld [vmem:[%s989_s30 + $0x30] sm:$0xff]  ;;  %v357_v62 = vld [vmem:[%s989_s30] sm:$0xff]  ;;  %v360_v63 = vld [vmem:[%s989_s30 + $0x18] sm:$0xff] }
  0x4e   : > { %440 = vmatpush1.msra.mxu0 %v381_v38  ;;  %511 = vmatpush1.msra.mxu1 %v383_v41  ;;  %v356_v0 = vld [vmem:[%s1083_s1] sm:$0xff]  ;;  %v359_v1 = vld [vmem:[%s989_s30 + $0x10] sm:$0xff] }
  0x4f   : > { %441 = vmatprep.subr.mxu0 %v378_v40  ;;  %512 = vmatprep.subr.mxu1 %v380_v43 }
  0x50   : > { %442 = vmatpush1.msra.mxu0 %v377_v42  ;;  %513 = vmatpush1.msra.mxu1 %v379_v45 }
  0x51   : > { %443 = vmatprep.subr.mxu0 %v374_v44  ;;  %514 = vmatprep.subr.mxu1 %v376_v47 }
  0x52   : > { %444 = vmatpush1.msra.mxu0 %v373_v46  ;;  %515 = vmatpush1.msra.mxu1 %v375_v49 }
  0x53   : > { %445 = vmatprep.subr.mxu0 %v370_v48  ;;  %516 = vmatprep.subr.mxu1 %v372_v51 }
  0x54   : > { %446 = vmatpush1.msra.mxu0 %v369_v50  ;;  %517 = vmatpush1.msra.mxu1 %v371_v53 }
  0x55   : > { %447 = vmatprep.subr.mxu0 %v366_v52  ;;  %518 = vmatprep.subr.mxu1 %v368_v55 }
  0x56   : > { %448 = vmatpush1.msra.mxu0 %v365_v54  ;;  %519 = vmatpush1.msra.mxu1 %v367_v57 }
  0x57   : > { %449 = vmatprep.subr.mxu0 %v362_v56  ;;  %520 = vmatprep.subr.mxu1 %v364_v59 }
  0x58   : > { %450 = vmatpush1.msra.mxu0 %v361_v58  ;;  %521 = vmatpush1.msra.mxu1 %v363_v61 }
  0x59   : > { %451 = vmatprep.subr.mxu0 %v358_v60  ;;  %522 = vmatprep.subr.mxu1 %v360_v63 }
  0x5a   : > { %452 = vmatpush1.msra.mxu0 %v357_v62  ;;  %523 = vmatpush1.msra.mxu1 %v359_v1 }
  0x5b   : > { %486 = vmatmul.mubr.f32.vlgmr.msra.gmra.mxu0 %v356_v0  ;;  %557 = vmatmul.mubr.f32.vlgmr.msra.gmra.mxu1 %v356_v0 }
 0x11b   : > { %v487_v2 = vpop.f32.mrf.mxu0  ;;  %v558_v3 = vpop.f32.mrf.mxu1 }
 0x11c   : > { %563 = vst [vmem:[%s347_s10] sm:$0xff] %v487_v2  ;;  %v574_v5 = vmul.f32 %v487_v2, %v487_v2  ;;  %v576_v8 = vmul.f32 %v558_v3, %v558_v3  ;;  %565 = vst [vmem:[%s347_s10 + $0x10] sm:$0xff] %v558_v3 }
 0x11d   : > { %v489_v4 = vpop.f32.mrf.mxu0  ;;  %v560_v9 = vpop.f32.mrf.mxu1 }
 0x11e   : > { %564 = vst [vmem:[%s347_s10 + $0x8] sm:$0xff] %v489_v4  ;;  %v567_v6 = vadd.f32 %v489_v4, %v487_v2  ;;  %v575_v7 = vmul.f32 %v489_v4, %v489_v4  ;;  %566 = vst [vmem:[%s347_s10 + $0x18] sm:$0xff] %v560_v9  ;;  %v577_v14 = vmul.f32 %v560_v9, %v560_v9 }
 0x120   : > { %v578_v10 = vadd.f32 %v575_v7, %v574_v5  ;;  %v568_v11 = vadd.f32 %v567_v6, %v558_v3 }
 0x122   : > { %v569_v12 = vadd.f32 %v568_v11, %v560_v9  ;;  %v579_v13 = vadd.f32 %v578_v10, %v576_v8 }
 0x124   : > { %570 = vadd.xlane.f32.xlu0 %v569_v12  ;;  %v580_v15 = vadd.f32 %v579_v13, %v577_v14 }
 0x128   : > { %581 = vadd.xlane.f32.xlu0 %v580_v15 }
 0x1ad   : > { %v571_v16 = vpop.xlane.xlu0 %570 }
 0x1ae   : > { %573 = vst.msk [vmem:[%s354_s19] sm:$0xff] %vm572_vm0, %v571_v16 }
 0x1b1   : > { %v582_v17 = vpop.xlane.xlu0 %581 }
 0x1b2   : > { %584 = vst.msk [vmem:[%s354_s19] sm:$0xff] %vm583_vm1, %v582_v17 }
 0x1b3 PF: > { %s14_s16 = sadd.s32 1, %s788_s16   ;;  %s1086_s12 = smov %s776_s13 }
 0x1b4   : > { %p11_p11 = scmp.ge.s32.totalorder %s14_s16, 4   ;;  %s1087_s13 = smov %s846_s20 }
 0x1b5   : > { %s1088_s14 = smov %s784_s15  ;;  %s1089_s15 = smov %s1091_s17 }
 0x1b6   :  { %13 = sbr.rel (!%p11_p11) target bundleno = 3 (0x3), region = 98 }

// kernel: mid_blocks_forward.5
= control target key start
LH: loop header
LB: loop body
LE: loop exit
PB: predicated region body
PF: predicated region fallthrough
CT: control target
= control target key end

     0   :  { %s410_s9 = smov 0   ;;  %s412_s10 = smov 0   ;;  %s446_s0 = inlined_call_operand.vmem [shape: f32[8,1024], index: 0, kind: input, shape index: {}]   ;;  %s447_s1 = inlined_call_operand.vmem [shape: f32[2,4,8,1], index: 1, kind: input, shape index: {}]   ;;  %s448_s2 = inlined_call_operand.vmem [shape: f32[8,1024], index: 2, kind: output, shape index: {}]  }
   0x1   :  { %s414_s11 = smov 0  }
   0x2 LB: > { %s24_s12 = sadd.s32 1, %s388_s10  ;;  %p330_p0 = scmp.ge.s32.totalorder %s392_s11, 1  ;;  %s392_s11 = sphi %s414_s11, %s12_s11   ;;  %s388_s10 = sphi %s412_s10, %s450_s10   ;;  %s384_s9 = sphi %s410_s9, %s449_s9  }
   0x3   : > { %p26_p1 = scmp.ge.s32.totalorder %s24_s12, 2  ;;  %p141_p2 = scmp.lt.s32.totalorder %s392_s11, 3 }
   0x5   : > { %s452_s12 = smov (%p26_p1, %s24_s12), 0  ;;  %p142_p3 = pnand %p330_p0, %p141_p2 }
   0x6   : > { %p178_p4 = scmp.lt.s32.totalorder (!%p142_p3), %s384_s9, 1  ;;  %s331_s18 = sshll.u32 (!%p142_p3), %s384_s9, 2 }
   0x7   : > { %145 = sbr.rel (%p142_p3) target bundleno = 155 (0x9b), region = 28  ;;  %p172_p5 = scmp.lt.s32.totalorder (!%p142_p3), %s331_s18, 7 }
   0xc   : > { %v394_v0 = vmov 0   ;;  %s179_s13 = scalar_select %p178_p4, %s384_s9, 1 }
   0xd   : > { %369 = vset.pattern.permute.xlu1 %v394_v0  ;;  %368 = vset.pattern.permute.xlu0 %v394_v0  ;;  %s454_s18 = smov (!%p172_p5, %s331_s18), 7 }
   0xe   : > { %s342_s14 = sshll.u32 %s179_s13, 5  ;;  %s332_s19 = sshll.u32 %s454_s18, 3 }
   0xf   : > { %s182_s17 = scalar_lea.vmem %s447_s1, %s342_s14  ;;  %s175_s22 = scalar_lea.vmem %s446_s0, %s332_s19 }
  0x10   : > { %v338_v1 = vld [vmem:[%s182_s17 + $0x10] sm:$0xff]  ;;  %v191_v2 = vld [vmem:[%s182_s17] sm:$0xff]  ;;  %v339_v3 = vld [vmem:[%s182_s17 + $0x18] sm:$0xff]  ;;  %s188_s25 = scalar_lea.vmem %s448_s2, %s332_s19 }
  0x11   : > { %222 = vperm.xlu1 %369, %v338_v1   ;;  %204 = vperm.xlu0 %368, %v191_v2   ;;  %v337_v4 = vld [vmem:[%s182_s17 + $0x8] sm:$0xff]  ;;  %v198_v5 = vld [vmem:[%s175_s22] sm:$0xff]  ;;  %v200_v8 = vld [vmem:[%s175_s22 + $0x10] sm:$0xff] }
  0x12   : > { %v199_v7 = vld [vmem:[%s175_s22 + $0x8] sm:$0xff]  ;;  %v201_v9 = vld [vmem:[%s175_s22 + $0x18] sm:$0xff] }
  0x15   : > { %231 = vperm.xlu1 %369, %v339_v3   ;;  %213 = vperm.xlu0 %368, %v337_v4  }
  0x8c   : > { %v205_v6 = vpop.permute.xlu0 %204  ;;  %v223_v10 = vpop.permute.xlu1 %222 }
  0x8d   : > { %v207_v11 = vmul.f32 %v205_v6, %v198_v5  ;;  %v208_v12 = vmul.f32 %v205_v6, %v199_v7  ;;  %v209_v13 = vmul.f32 %v205_v6, %v200_v8  ;;  %v210_v14 = vmul.f32 %v205_v6, %v201_v9 }
  0x90   : > { %v214_v15 = vpop.permute.xlu0 %213  ;;  %v232_v24 = vpop.permute.xlu1 %231 }
  0x91   : > { %v216_v16 = vadd.f32 %v214_v15, %v207_v11  ;;  %v217_v17 = vadd.f32 %v214_v15, %v208_v12  ;;  %v218_v18 = vadd.f32 %v214_v15, %v209_v13  ;;  %v219_v19 = vadd.f32 %v214_v15, %v210_v14 }
  0x93   : > { %v225_v20 = vmul.f32 %v223_v10, %v216_v16  ;;  %v226_v21 = vmul.f32 %v223_v10, %v217_v17  ;;  %v227_v22 = vmul.f32 %v223_v10, %v218_v18  ;;  %v228_v23 = vmul.f32 %v223_v10, %v219_v19 }
  0x95   : > { %v234_v25 = vadd.f32 %v232_v24, %v225_v20  ;;  %v235_v26 = vadd.f32 %v232_v24, %v226_v21  ;;  %v236_v27 = vadd.f32 %v232_v24, %v227_v22  ;;  %v237_v28 = vadd.f32 %v232_v24, %v228_v23 }
  0x97   : > { %v238_v29 = vmax.f32 %v234_v25, 0.0  ;;  %v239_v30 = vmax.f32 %v235_v26, 0.0  ;;  %v240_v31 = vmax.f32 %v236_v27, 0.0  ;;  %v241_v32 = vmax.f32 %v237_v28, 0.0 }
  0x99   : > { %242 = vst [vmem:[%s188_s25] sm:$0xff] %v238_v29  ;;  %243 = vst [vmem:[%s188_s25 + $0x8] sm:$0xff] %v239_v30 }
  0x9a   : > { %244 = vst [vmem:[%s188_s25 + $0x10] sm:$0xff] %v240_v31  ;;  %245 = vst [vmem:[%s188_s25 + $0x18] sm:$0xff] %v241_v32 }
  0x9b PF: > { %s12_s11 = sadd.s32 1, %s392_s11   ;;  %s449_s9 = smov %s388_s10 }
  0x9c   : > { %p9_p6 = scmp.ge.s32.totalorder %s12_s11, 4   ;;  %s450_s10 = smov %s452_s12 }
  0x9e   :  { %11 = sbr.rel (!%p9_p6) target bundleno = 2 (0x2), region = 64 }

// kernel: mid_blocks_forward.6
= control target key start
LH: loop header
LB: loop body
LE: loop exit
PB: predicated region body
PF: predicated region fallthrough
CT: control target
= control target key end

     0   :  { %s1020_s12 = smov 0   ;;  %s1022_s13 = smov 0   ;;  %s1497_s0 = inlined_call_operand.vmem [shape: f32[256,1024], index: 0, kind: input, shape index: {}]   ;;  %s1498_s1 = inlined_call_operand.vmem [shape: f32[4,256], index: 1, kind: input, shape index: {}]   ;;  %s1499_s2 = inlined_call_operand.vmem [shape: f32[4,1024], index: 2, kind: output, shape index: {0}]   ;;  %s1500_s3 = inlined_call_operand.vmem [shape: f32[2,4,2], index: 3, kind: output, shape index: {1}]  }
   0x1   :  { %s1024_s14 = smov 0   ;;  %s1026_s15 = smov 0  }
   0x2   :  { %s1028_s16 = smov 0  }
   0x3 LB: > { %s26_s17 = sadd.s32 1, %s994_s15  ;;  %p42_p1 = scmp.ne.s32.totalorder %s986_s13, %s982_s12  ;;  %s998_s16 = sphi %s1028_s16, %s14_s16   ;;  %s994_s15 = sphi %s1026_s15, %s1504_s15   ;;  %s990_s14 = sphi %s1024_s14, %s1503_s14   ;;  %s986_s13 = sphi %s1022_s13, %s1502_s13   ;;  %s982_s12 = sphi %s1020_s12, %s1501_s12  }
   0x4   : > { %p28_p0 = scmp.ge.s32.totalorder %s26_s17, 2  ;;  %p43_p2 = scmp.eq.s32.totalorder %s998_s16, 0 }
   0x5   : > { %s35_s19 = sadd.s32 1, %s986_s13  ;;  %p907_p5 = scmp.ge.s32.totalorder %s998_s16, 2 }
   0x6   : > { %s1506_s17 = smov (%p28_p0, %s26_s17), 0  ;;  %p44_p3 = por %p43_p2, %p42_p1 }
   0x7   : > { %s32_s18 = ssub.s32 %s994_s15, %s1506_s17  ;;  %148 = sbr.rel (%p907_p5) target bundleno = 80 (0x50), region = 20 }
   0x8   : > { %p33_p4 = scmp.eq.s32.totalorder %s32_s18, 0 }
   0xa   : > { %s1055_s20 = scalar_select %p33_p4, %s986_s13, %s35_s19  }
   0xc   : > { %151 = sbr.rel (!%p44_p3) target bundleno = 80 (0x50), region = 24  ;;  %s153_s21 = sand.u32 (%p44_p3), 1, %s986_s13  }
   0xd   : > { %s918_s22 = sshll.u32 (%p44_p3), %s994_s15, 5  ;;  %s908_s23 = sshll.u32 (%p44_p3), %s153_s21, 10 }
   0xe   : > { %s1063_s26 = scalar_lea.vmem (%p44_p3), %s1497_s0, %s918_s22  ;;  %s1068_s27 = scalar_lea.vmem (%p44_p3), [#allocation2], %s908_s23 }
   0xf   : > { %v172_v0 = vld [vmem:[%s1063_s26] sm:$0xff] (%p44_p3)  ;;  %v174_v1 = vld [vmem:[%s1063_s26 + $0x8] sm:$0xff] (%p44_p3)  ;;  %v176_v2 = vld [vmem:[%s1063_s26 + $0x10] sm:$0xff] (%p44_p3) }
  0x10   : > { %173 = vst [vmem:[%s1068_s27] sm:$0xff] (%p44_p3), %v172_v0  ;;  %175 = vst [vmem:[%s1068_s27 + $0x8] sm:$0xff] (%p44_p3), %v174_v1  ;;  %v178_v3 = vld [vmem:[%s1063_s26 + $0x18] sm:$0xff] (%p44_p3)  ;;  %v180_v4 = vld [vmem:[%s1063_s26 + $0x40] sm:$0xff] (%p44_p3) }
  0x11   : > { %177 = vst [vmem:[%s1068_s27 + $0x10] sm:$0xff] %v176_v2  ;;  %v182_v5 = vld [vmem:[%s1063_s26 + $0x48] sm:$0xff]  ;;  %179 = vst [vmem:[%s1068_s27 + $0x18] sm:$0xff] %v178_v3  ;;  %v184_v6 = vld [vmem:[%s1063_s26 + $0x50] sm:$0xff] }
  0x12   : > { %181 = vst [vmem:[%s1068_s27 + $0x20] sm:$0xff] %v180_v4  ;;  %183 = vst [vmem:[%s1068_s27 + $0x28] sm:$0xff] %v182_v5  ;;  %v186_v7 = vld [vmem:[%s1063_s26 + $0x58] sm:$0xff]  ;;  %v188_v8 = vld [vmem:[%s1063_s26 + $0x80] sm:$0xff] }
  0x13   : > { %185 = vst [vmem:[%s1068_s27 + $0x30] sm:$0xff] %v184_v6  ;;  %187 = vst [vmem:[%s1068_s27 + $0x38] sm:$0xff] %v186_v7  ;;  %v190_v9 = vld [vmem:[%s1063_s26 + $0x88] sm:$0xff]  ;;  %v192_v10 = vld [vmem:[%s1063_s26 + $0x90] sm:$0xff] }
  0x14   : > { %189 = vst [vmem:[%s1068_s27 + $0x40] sm:$0xff] %v188_v8  ;;  %v194_v11 = vld [vmem:[%s1063_s26 + $0x98] sm:$0xff]  ;;  %191 = vst [vmem:[%s1068_s27 + $0x48] sm:$0xff] %v190_v9  ;;  %v196_v12 = vld [vmem:[%s1063_s26 + $0xc0] sm:$0xff] }
  0x15   : > { %193 = vst [vmem:[%s1068_s27 + $0x50] sm:$0xff] %v192_v10  ;;  %195 = vst [vmem:[%s1068_s27 + $0x58] sm:$0xff] %v194_v11  ;;  %v198_v13 = vld [vmem:[%s1063_s26 + $0xc8] sm:$0xff]  ;;  %v200_v14 = vld [vmem:[%s1063_s26 + $0xd0] sm:$0xff] }
  0x16   : > { %197 = vst [vmem:[%s1068_s27 + $0x60] sm:$0xff] %v196_v12  ;;  %199 = vst [vmem:[%s1068_s27 + $0x68] sm:$0xff] %v198_v13  ;;  %v202_v15 = vld [vmem:[%s1063_s26 + $0xd8] sm:$0xff]  ;;  %v204_v16 = vld [vmem:[%s1063_s26 + $0x100] sm:$0xff] }
  0x17   : > { %201 = vst [vmem:[%s1068_s27 + $0x70] sm:$0xff] %v200_v14  ;;  %v206_v17 = vld [vmem:[%s1063_s26 + $0x108] sm:$0xff]  ;;  %203 = vst [vmem:[%s1068_s27 + $0x78] sm:$0xff] %v202_v15  ;;  %v208_v18 = vld [vmem:[%s1063_s26 + $0x110] sm:$0xff] }
  0x18   : > { %205 = vst [vmem:[%s1068_s27 + $0x80] sm:$0xff] %v204_v16  ;;  %207 = vst [vmem:[%s1068_s27 + $0x88] sm:$0xff] %v206_v17  ;;  %v210_v19 = vld [vmem:[%s1063_s26 + $0x118] sm:$0xff]  ;;  %v212_v20 = vld [vmem:[%s1063_s26 + $0x140] sm:$0xff] }
  0x19   : > { %209 = vst [vmem:[%s1068_s27 + $0x90] sm:$0xff] %v208_v18  ;;  %211 = vst [vmem:[%s1068_s27 + $0x98] sm:$0xff] %v210_v19  ;;  %v214_v21 = vld [vmem:[%s1063_s26 + $0x148] sm:$0xff]  ;;  %v216_v22 = vld [vmem:[%s1063_s26 + $0x150] sm:$0xff] }
  0x1a   : > { %213 = vst [vmem:[%s1068_s27 + $0xa0] sm:$0xff] %v212_v20  ;;  %v218_v23 = vld [vmem:[%s1063_s26 + $0x158] sm:$0xff]  ;;  %215 = vst [vmem:[%s1068_s27 + $0xa8] sm:$0xff] %v214_v21  ;;  %v220_v24 = vld [vmem:[%s1063_s26 + $0x180] sm:$0xff] }
  0x1b   : > { %217 = vst [vmem:[%s1068_s27 + $0xb0] sm:$0xff] %v216_v22  ;;  %219 = vst [vmem:[%s1068_s27 + $0xb8] sm:$0xff] %v218_v23  ;;  %v222_v25 = vld [vmem:[%s1063_s26 + $0x188] sm:$0xff]  ;;  %v224_v26 = vld [vmem:[%s1063_s26 + $0x190] sm:$0xff] }
  0x1c   : > { %221 = vst [vmem:[%s1068_s27 + $0xc0] sm:$0xff] %v220_v24  ;;  %223 = vst [vmem:[%s1068_s27 + $0xc8] sm:$0xff] %v222_v25  ;;  %v226_v27 = vld [vmem:[%s1063_s26 + $0x198] sm:$0xff]  ;;  %v228_v28 = vld [vmem:[%s1063_s26 + $0x1c0] sm:$0xff] }
  0x1d   : > { %225 = vst [vmem:[%s1068_s27 + $0xd0] sm:$0xff] %v224_v26  ;;  %v230_v29 = vld [vmem:[%s1063_s26 + $0x1c8] sm:$0xff]  ;;  %227 = vst [vmem:[%s1068_s27 + $0xd8] sm:$0xff] %v226_v27  ;;  %v232_v30 = vld [vmem:[%s1063_s26 + $0x1d0] sm:$0xff] }
  0x1e   : > { %229 = vst [vmem:[%s1068_s27 + $0xe0] sm:$0xff] %v228_v28  ;;  %231 = vst [vmem:[%s1068_s27 + $0xe8] sm:$0xff] %v230_v29  ;;  %v234_v31 = vld [vmem:[%s1063_s26 + $0x1d8] sm:$0xff]  ;;  %v236_v32 = vld [vmem:[%s1063_s26 + $0x200] sm:$0xff] }
  0x1f   : > { %233 = vst [vmem:[%s1068_s27 + $0xf0] sm:$0xff] %v232_v30  ;;  %235 = vst [vmem:[%s1068_s27 + $0xf8] sm:$0xff] %v234_v31  ;;  %v238_v33 = vld [vmem:[%s1063_s26 + $0x208] sm:$0xff]  ;;  %v240_v34 = vld [vmem:[%s1063_s26 + $0x210] sm:$0xff] }
  0x20   : > { %237 = vst [vmem:[%s1068_s27 + $0x100] sm:$0xff] %v236_v32  ;;  %v242_v35 = vld [vmem:[%s1063_s26 + $0x218] sm:$0xff]  ;;  %239 = vst [vmem:[%s1068_s27 + $0x108] sm:$0xff] %v238_v33  ;;  %v244_v36 = vld [vmem:[%s1063_s26 + $0x240] sm:$0xff] }
  0x21   : > { %241 = vst [vmem:[%s1068_s27 + $0x110] sm:$0xff] %v240_v34  ;;  %243 = vst [vmem:[%s1068_s27 + $0x118] sm:$0xff] %v242_v35  ;;  %v246_v37 = vld [vmem:[%s1063_s26 + $0x248] sm:$0xff]  ;;  %v248_v38 = vld [vmem:[%s1063_s26 + $0x250] sm:$0xff] }
  0x22   : > { %245 = vst [vmem:[%s1068_s27 + $0x120] sm:$0xff] %v244_v36  ;;  %247 = vst [vmem:[%s1068_s27 + $0x128] sm:$0xff] %v246_v37  ;;  %v250_v39 = vld [vmem:[%s1063_s26 + $0x258] sm:$0xff]  ;;  %v252_v40 = vld [vmem:[%s1063_s26 + $0x280] sm:$0xff] }
  0x23   : > { %249 = vst [vmem:[%s1068_s27 + $0x130] sm:$0xff] %v248_v38  ;;  %v254_v41 = vld [vmem:[%s1063_s26 + $0x288] sm:$0xff]  ;;  %251 = vst [vmem:[%s1068_s27 + $0x138] sm:$0xff] %v250_v39  ;;  %v256_v42 = vld [vmem:[%s1063_s26 + $0x290] sm:$0xff] }
  0x24   : > { %253 = vst [vmem:[%s1068_s27 + $0x140] sm:$0xff] %v252_v40  ;;  %255 = vst [vmem:[%s1068_s27 + $0x148] sm:$0xff] %v254_v41  ;;  %v258_v43 = vld [vmem:[%s1063_s26 + $0x298] sm:$0xff]  ;;  %v260_v44 = vld [vmem:[%s1063_s26 + $0x2c0] sm:$0xff] }
  0x25   : > { %257 = vst [vmem:[%s1068_s27 + $0x150] sm:$0xff] %v256_v42  ;;  %259 = vst [vmem:[%s1068_s27 + $0x158] sm:$0xff] %v258_v43  ;;  %v262_v45 = vld [vmem:[%s1063_s26 + $0x2c8] sm:$0xff]  ;;  %v264_v46 = vld [vmem:[%s1063_s26 + $0x2d0] sm:$0xff] }
  0x26   : > { %261 = vst [vmem:[%s1068_s27 + $0x160] sm:$0xff] %v260_v44  ;;  %v266_v47 = vld [vmem:[%s1063_s26 + $0x2d8] sm:$0xff]  ;;  %263 = vst [vmem:[%s1068_s27 + $0x168] sm:$0xff] %v262_v45  ;;  %v268_v48 = vld [vmem:[%s1063_s26 + $0x300] sm:$0xff] }
  0x27   : > { %265 = vst [vmem:[%s1068_s27 + $0x170] sm:$0xff] %v264_v46  ;;  %267 = vst [vmem:[%s1068_s27 + $0x178] sm:$0xff] %v266_v47  ;;  %v270_v49 = vld [vmem:[%s1063_s26 + $0x308] sm:$0xff]  ;;  %v272_v50 = vld [vmem:[%s1063_s26 + $0x310] sm:$0xff] }
  0x28   : > { %269 = vst [vmem:[%s1068_s27 + $0x180] sm:$0xff] %v268_v48  ;;  %271 = vst [vmem:[%s1068_s27 + $0x188] sm:$0xff] %v270_v49  ;;  %v274_v51 = vld [vmem:[%s1063_s26 + $0x318] sm:$0xff]  ;;  %v276_v52 = vld [vmem:[%s1063_s26 + $0x340] sm:$0xff] }
  0x29   : > { %273 = vst [vmem:[%s1068_s27 + $0x190] sm:$0xff] %v272_v50  ;;  %v278_v53 = vld [vmem:[%s1063_s26 + $0x348] sm:$0xff]  ;;  %275 = vst [vmem:[%s1068_s27 + $0x198] sm:$0xff] %v274_v51  ;;  %v280_v54 = vld [vmem:[%s1063_s26 + $0x350] sm:$0xff] }
  0x2a   : > { %277 = vst [vmem:[%s1068_s27 + $0x1a0] sm:$0xff] %v276_v52  ;;  %279 = vst [vmem:[%s1068_s27 + $0x1a8] sm:$0xff] %v278_v53  ;;  %v282_v55 = vld [vmem:[%s1063_s26 + $0x358] sm:$0xff]  ;;  %v284_v56 = vld [vmem:[%s1063_s26 + $0x380] sm:$0xff] }
  0x2b   : > { %281 = vst [vmem:[%s1068_s27 + $0x1b0] sm:$0xff] %v280_v54  ;;  %283 = vst [vmem:[%s1068_s27 + $0x1b8] sm:$0xff] %v282_v55  ;;  %v286_v57 = vld [vmem:[%s1063_s26 + $0x388] sm:$0xff]  ;;  %v288_v58 = vld [vmem:[%s1063_s26 + $0x390] sm:$0xff] }
  0x2c   : > { %285 = vst [vmem:[%s1068_s27 + $0x1c0] sm:$0xff] %v284_v56  ;;  %v290_v59 = vld [vmem:[%s1063_s26 + $0x398] sm:$0xff]  ;;  %287 = vst [vmem:[%s1068_s27 + $0x1c8] sm:$0xff] %v286_v57  ;;  %v292_v60 = vld [vmem:[%s1063_s26 + $0x3c0] sm:$0xff] }
  0x2d   : > { %289 = vst [vmem:[%s1068_s27 + $0x1d0] sm:$0xff] %v288_v58  ;;  %291 = vst [vmem:[%s1068_s27 + $0x1d8] sm:$0xff] %v290_v59  ;;  %v294_v61 = vld [vmem:[%s1063_s26 + $0x3c8] sm:$0xff]  ;;  %v296_v62 = vld [vmem:[%s1063_s26 + $0x3d0] sm:$0xff] }
  0x2e   : > { %293 = vst [vmem:[%s1068_s27 + $0x1e0] sm:$0xff] %v292_v60  ;;  %295 = vst [vmem:[%s1068_s27 + $0x1e8] sm:$0xff] %v294_v61  ;;  %v298_v63 = vld [vmem:[%s1063_s26 + $0x3d8] sm:$0xff]  ;;  %v300_v0 = vld [vmem:[%s1063_s26 + $0x400] sm:$0xff] }
  0x2f   : > { %297 = vst [vmem:[%s1068_s27 + $0x1f0] sm:$0xff] %v296_v62  ;;  %v302_v1 = vld [vmem:[%s1063_s26 + $0x408] sm:$0xff]  ;;  %299 = vst [vmem:[%s1068_s27 + $0x1f8] sm:$0xff] %v298_v63  ;;  %v304_v2 = vld [vmem:[%s1063_s26 + $0x410] sm:$0xff] }
  0x30   : > { %301 = vst [vmem:[%s1068_s27 + $0x200] sm:$0xff] %v300_v0  ;;  %303 = vst [vmem:[%s1068_s27 + $0x208] sm:$0xff] %v302_v1  ;;  %v306_v3 = vld [vmem:[%s1063_s26 + $0x418] sm:$0xff]  ;;  %v308_v4 = vld [vmem:[%s1063_s26 + $0x440] sm:$0xff] }
  0x31   : > { %305 = vst [vmem:[%s1068_s27 + $0x210] sm:$0xff] %v304_v2  ;;  %307 = vst [vmem:[%s1068_s27 + $0x218] sm:$0xff] %v306_v3  ;;  %v310_v5 = vld [vmem:[%s1063_s26 + $0x448] sm:$0xff]  ;;  %v312_v6 = vld [vmem:[%s1063_s26 + $0x450] sm:$0xff] }
  0x32   : > { %309 = vst [vmem:[%s1068_s27 + $0x220] sm:$0xff] %v308_v4  ;;  %v314_v7 = vld [vmem:[%s1063_s26 + $0x458] sm:$0xff]  ;;  %311 = vst [vmem:[%s1068_s27 + $0x228] sm:$0xff] %v310_v5  ;;  %v316_v8 = vld [vmem:[%s1063_s26 + $0x480] sm:$0xff] }
  0x33   : > { %313 = vst [vmem:[%s1068_s27 + $0x230] sm:$0xff] %v312_v6  ;;  %315 = vst [vmem:[%s1068_s27 + $0x238] sm:$0xff] %v314_v7  ;;  %v318_v9 = vld [vmem:[%s1063_s26 + $0x488] sm:$0xff]  ;;  %v320_v10 = vld [vmem:[%s1063_s26 + $0x490] sm:$0xff] }
  0x34   : > { %317 = vst [vmem:[%s1068_s27 + $0x240] sm:$0xff] %v316_v8  ;;  %319 = vst [vmem:[%s1068_s27 + $0x248] sm:$0xff] %v318_v9  ;;  %v322_v11 = vld [vmem:[%s1063_s26 + $0x498] sm:$0xff]  ;;  %v324_v12 = vld [vmem:[%s1063_s26 + $0x4c0] sm:$0xff] }
  0x35   : > { %321 = vst [vmem:[%s1068_s27 + $0x250] sm:$0xff] %v320_v10  ;;  %v326_v13 = vld [vmem:[%s1063_s26 + $0x4c8] sm:$0xff]  ;;  %323 = vst [vmem:[%s1068_s27 + $0x258] sm:$0xff] %v322_v11  ;;  %v328_v14 = vld [vmem:[%s1063_s26 + $0x4d0] sm:$0xff] }
  0x36   : > { %325 = vst [vmem:[%s1068_s27 + $0x260] sm:$0xff] %v324_v12  ;;  %327 = vst [vmem:[%s1068_s27 + $0x268] sm:$0xff] %v326_v13  ;;  %v330_v15 = vld [vmem:[%s1063_s26 + $0x4d8] sm:$0xff]  ;;  %v332_v16 = vld [vmem:[%s1063_s26 + $0x500] sm:$0xff] }
  0x37   : > { %329 = vst [vmem:[%s1068_s27 + $0x270] sm:$0xff] %v328_v14  ;;  %331 = vst [vmem:[%s1068_s27 + $0x278] sm:$0xff] %v330_v15  ;;  %v334_v17 = vld [vmem:[%s1063_s26 + $0x508] sm:$0xff]  ;;  %v336_v18 = vld [vmem:[%s1063_s26 + $0x510] sm:$0xff] }
  0x38   : > { %333 = vst [vmem:[%s1068_s27 + $0x280] sm:$0xff] %v332_v16  ;;  %v338_v19 = vld [vmem:[%s1063_s26 + $0x518] sm:$0xff]  ;;  %335 = vst [vmem:[%s1068_s27 + $0x288] sm:$0xff] %v334_v17  ;;  %v340_v20 = vld [vmem:[%s1063_s26 + $0x540] sm:$0xff] }
  0x39   : > { %337 = vst [vmem:[%s1068_s27 + $0x290] sm:$0xff] %v336_v18  ;;  %339 = vst [vmem:[%s1068_s27 + $0x298] sm:$0xff] %v338_v19  ;;  %v342_v21 = vld [vmem:[%s1063_s26 + $0x548] sm:$0xff]  ;;  %v344_v22 = vld [vmem:[%s1063_s26 + $0x550] sm:$0xff] }
  0x3a   : > { %341 = vst [vmem:[%s1068_s27 + $0x2a0] sm:$0xff] %v340_v20  ;;  %343 = vst [vmem:[%s1068_s27 + $0x2a8] sm:$0xff] %v342_v21  ;;  %v346_v23 = vld [vmem:[%s1063_s26 + $0x558] sm:$0xff]  ;;  %v348_v24 = vld [vmem:[%s1063_s26 + $0x580] sm:$0xff] }
  0x3b   : > { %345 = vst [vmem:[%s1068_s27 + $0x2b0] sm:$0xff] %v344_v22  ;;  %v350_v25 = vld [vmem:[%s1063_s26 + $0x588] sm:$0xff]  ;;  %347 = vst [vmem:[%s1068_s27 + $0x2b8] sm:$0xff] %v346_v23  ;;  %v352_v26 = vld [vmem:[%s1063_s26 + $0x590] sm:$0xff] }
  0x3c   : > { %349 = vst [vmem:[%s1068_s27 + $0x2c0] sm:$0xff] %v348_v24  ;;  %351 = vst [vmem:[%s1068_s27 + $0x2c8] sm:$0xff] %v350_v25  ;;  %v354_v27 = vld [vmem:[%s1063_s26 + $0x598] sm:$0xff]  ;;  %v356_v28 = vld [vmem:[%s1063_s26 + $0x5c0] sm:$0xff] }
  0x3d   : > { %353 = vst [vmem:[%s1068_s27 + $0x2d0] sm:$0xff] %v352_v26  ;;  %355 = vst [vmem:[%s1068_s27 + $0x2d8] sm:$0xff] %v354_v27  ;;  %v358_v29 = vld [vmem:[%s1063_s26 + $0x5c8] sm:$0xff]  ;;  %v360_v30 = vld [vmem:[%s1063_s26 + $0x5d0] sm:$0xff] }
  0x3e   : > { %357 = vst [vmem:[%s1068_s27 + $0x2e0] sm:$0xff] %v356_v28  ;;  %v362_v31 = vld [vmem:[%s1063_s26 + $0x5d8] sm:$0xff]  ;;  %359 = vst [vmem:[%s1068_s27 + $0x2e8] sm:$0xff] %v358_v29  ;;  %v364_v32 = vld [vmem:[%s1063_s26 + $0x600] sm:$0xff] }
  0x3f   : > { %361 = vst [vmem:[%s1068_s27 + $0x2f0] sm:$0xff] %v360_v30  ;;  %363 = vst [vmem:[%s1068_s27 + $0x2f8] sm:$0xff] %v362_v31  ;;  %v366_v33 = vld [vmem:[%s1063_s26 + $0x608] sm:$0xff]  ;;  %v368_v34 = vld [vmem:[%s1063_s26 + $0x610] sm:$0xff] }
  0x40   : > { %365 = vst [vmem:[%s1068_s27 + $0x300] sm:$0xff] %v364_v32  ;;  %367 = vst [vmem:[%s1068_s27 + $0x308] sm:$0xff] %v366_v33  ;;  %v370_v35 = vld [vmem:[%s1063_s26 + $0x618] sm:$0xff]  ;;  %v372_v36 = vld [vmem:[%s1063_s26 + $0x640] sm:$0xff] }
  0x41   : > { %369 = vst [vmem:[%s1068_s27 + $0x310] sm:$0xff] %v368_v34  ;;  %v374_v37 = vld [vmem:[%s1063_s26 + $0x648] sm:$0xff]  ;;  %371 = vst [vmem:[%s1068_s27 + $0x318] sm:$0xff] %v370_v35  ;;  %v376_v38 = vld [vmem:[%s1063_s26 + $0x650] sm:$0xff] }
  0x42   : > { %373 = vst [vmem:[%s1068_s27 + $0x320] sm:$0xff] %v372_v36  ;;  %375 = vst [vmem:[%s1068_s27 + $0x328] sm:$0xff] %v374_v37  ;;  %v378_v39 = vld [vmem:[%s1063_s26 + $0x658] sm:$0xff]  ;;  %v380_v40 = vld [vmem:[%s1063_s26 + $0x680] sm:$0xff] }
  0x43   : > { %377 = vst [vmem:[%s1068_s27 + $0x330] sm:$0xff] %v376_v38  ;;  %379 = vst [vmem:[%s1068_s27 + $0x338] sm:$0xff] %v378_v39  ;;  %v382_v41 = vld [vmem:[%s1063_s26 + $0x688] sm:$0xff]  ;;  %v384_v42 = vld [vmem:[%s1063_s26 + $0x690] sm:$0xff] }
  0x44   : > { %381 = vst [vmem:[%s1068_s27 + $0x340] sm:$0xff] %v380_v40  ;;  %v386_v43 = vld [vmem:[%s1063_s26 + $0x698] sm:$0xff]  ;;  %383 = vst [vmem:[%s1068_s27 + $0x348] sm:$0xff] %v382_v41  ;;  %v388_v44 = vld [vmem:[%s1063_s26 + $0x6c0] sm:$0xff] }
  0x45   : > { %385 = vst [vmem:[%s1068_s27 + $0x350] sm:$0xff] %v384_v42  ;;  %387 = vst [vmem:[%s1068_s27 + $0x358] sm:$0xff] %v386_v43  ;;  %v390_v45 = vld [vmem:[%s1063_s26 + $0x6c8] sm:$0xff]  ;;  %v392_v46 = vld [vmem:[%s1063_s26 + $0x6d0] sm:$0xff] }
  0x46   : > { %389 = vst [vmem:[%s1068_s27 + $0x360] sm:$0xff] %v388_v44  ;;  %391 = vst [vmem:[%s1068_s27 + $0x368] sm:$0xff] %v390_v45  ;;  %v394_v47 = vld [vmem:[%s1063_s26 + $0x6d8] sm:$0xff]  ;;  %v396_v48 = vld [vmem:[%s1063_s26 + $0x700] sm:$0xff] }
  0x47   : > { %393 = vst [vmem:[%s1068_s27 + $0x370] sm:$0xff] %v392_v46  ;;  %v398_v49 = vld [vmem:[%s1063_s26 + $0x708] sm:$0xff]  ;;  %395 = vst [vmem:[%s1068_s27 + $0x378] sm:$0xff] %v394_v47  ;;  %v400_v50 = vld [vmem:[%s1063_s26 + $0x710] sm:$0xff] }
  0x48   : > { %397 = vst [vmem:[%s1068_s27 + $0x380] sm:$0xff] %v396_v48  ;;  %399 = vst [vmem:[%s1068_s27 + $0x388] sm:$0xff] %v398_v49  ;;  %v402_v51 = vld [vmem:[%s1063_s26 + $0x718] sm:$0xff]  ;;  %v404_v52 = vld [vmem:[%s1063_s26 + $0x740] sm:$0xff] }
  0x49   : > { %401 = vst [vmem:[%s1068_s27 + $0x390] sm:$0xff] %v400_v50  ;;  %403 = vst [vmem:[%s1068_s27 + $0x398] sm:$0xff] %v402_v51  ;;  %v406_v53 = vld [vmem:[%s1063_s26 + $0x748] sm:$0xff]  ;;  %v408_v54 = vld [vmem:[%s1063_s26 + $0x750] sm:$0xff] }
  0x4a   : > { %405 = vst [vmem:[%s1068_s27 + $0x3a0] sm:$0xff] %v404_v52  ;;  %v410_v55 = vld [vmem:[%s1063_s26 + $0x758] sm:$0xff]  ;;  %407 = vst [vmem:[%s1068_s27 + $0x3a8] sm:$0xff] %v406_v53  ;;  %v412_v56 = vld [vmem:[%s1063_s26 + $0x780] sm:$0xff] }
  0x4b   : > { %409 = vst [vmem:[%s1068_s27 + $0x3b0] sm:$0xff] %v408_v54  ;;  %411 = vst [vmem:[%s1068_s27 + $0x3b8] sm:$0xff] %v410_v55  ;;  %v414_v57 = vld [vmem:[%s1063_s26 + $0x788] sm:$0xff]  ;;  %v416_v58 = vld [vmem:[%s1063_s26 + $0x790] sm:$0xff] }
  0x4c   : > { %413 = vst [vmem:[%s1068_s27 + $0x3c0] sm:$0xff] %v412_v56  ;;  %415 = vst [vmem:[%s1068_s27 + $0x3c8] sm:$0xff] %v414_v57  ;;  %v418_v59 = vld [vmem:[%s1063_s26 + $0x798] sm:$0xff]  ;;  %v420_v60 = vld [vmem:[%s1063_s26 + $0x7c0] sm:$0xff] }
  0x4d   : > { %417 = vst [vmem:[%s1068_s27 + $0x3d0] sm:$0xff] %v416_v58  ;;  %v422_v61 = vld [vmem:[%s1063_s26 + $0x7c8] sm:$0xff]  ;;  %419 = vst [vmem:[%s1068_s27 + $0x3d8] sm:$0xff] %v418_v59  ;;  %v424_v62 = vld [vmem:[%s1063_s26 + $0x7d0] sm:$0xff] }
  0x4e   : > { %421 = vst [vmem:[%s1068_s27 + $0x3e0] sm:$0xff] %v420_v60  ;;  %423 = vst [vmem:[%s1068_s27 + $0x3e8] sm:$0xff] %v422_v61  ;;  %v426_v63 = vld [vmem:[%s1063_s26 + $0x7d8] sm:$0xff] }
  0x4f   : > { %425 = vst [vmem:[%s1068_s27 + $0x3f0] sm:$0xff] %v424_v62  ;;  %427 = vst [vmem:[%s1068_s27 + $0x3f8] sm:$0xff] %v426_v63 }
  0x50 PF: > { %p911_p6 = scmp.ge.s32.totalorder %s998_s16, 1  ;;  %p432_p7 = scmp.lt.s32.totalorder %s998_s16, 3 }
  0x52   : > { %p433_p8 = pnand %p911_p6, %p432_p7 }
  0x53   : > { %s439_s28 = sand.u32 (!%p433_p8), 1, %s982_s12   ;;  %s913_s6 = sshll.u32 (!%p433_p8), %s990_s14, 2 }
  0x54   : > { %436 = sbr.rel (%p433_p8) target bundleno = 500 (0x1f4), region = 47  ;;  %s912_s4 = sshll.u32 (!%p433_p8), %s439_s28, 10 }
  0x55   : > { %s1333_s5 = scalar_lea.vmem (!%p433_p8), [#allocation2], %s912_s4  ;;  %p472_p9 = scmp.lt.s32.totalorder (!%p433_p8), %s913_s6, 7 }
  0x56   : > { %p479_p10 = scmp.lt.s32.totalorder (!%p433_p8), %s990_s14, 1 }
  0x59   : > { %v1329_v0 = vld [vmem:[%s1498_s1] sm:$0xff]  ;;  %v546_v2 = vld [vmem:[%s1333_s5 + $0x1e8] sm:$0xff]  ;;  %v548_v5 = vld [vmem:[%s1333_s5 + $0x1f8] sm:$0xff]  ;;  %s1508_s6 = smov (!%p472_p9, %s913_s6), 7  ;;  %vm768_vm0 = vcmask 1043456   ;;  %s1510_s14 = smov (!%p479_p10, %s990_s14), 1 }
  0x5a   : > { %v614_v1 = vcombine.high %v1329_v0, %v1329_v0  ;;  %v545_v3 = vld [vmem:[%s1333_s5 + $0x1e0] sm:$0xff]  ;;  %v542_v4 = vld [vmem:[%s1333_s5 + $0x1c8] sm:$0xff]  ;;  %616 = vmatprep.subr.mxu0 %v546_v2  ;;  %v547_v7 = vld [vmem:[%s1333_s5 + $0x1f0] sm:$0xff]  ;;  %687 = vmatprep.subr.mxu1 %v548_v5  ;;  %s914_s7 = sshll.u32 %s1508_s6, 2  ;;  %s915_s11 = sshll.u32 %s1510_s14, 2  ;;  %vm778_vm1 = vcmask 3072  }
  0x5b   : > { %v541_v6 = vld [vmem:[%s1333_s5 + $0x1c0] sm:$0xff]  ;;  %617 = vmatpush1.msra.mxu0 %v545_v3  ;;  %v538_v8 = vld [vmem:[%s1333_s5 + $0x1a8] sm:$0xff]  ;;  %v544_v9 = vld [vmem:[%s1333_s5 + $0x1d8] sm:$0xff]  ;;  %688 = vmatpush1.msra.mxu1 %v547_v7  ;;  %s475_s10 = scalar_lea.vmem %s1499_s2, %s914_s7  ;;  %s482_s19 = scalar_lea.vmem %s1500_s3, %s915_s11  ;;  %vm793_vm2 = vcmask 11272  }
  0x5c   : > { %680 = vmatprep.mubr.f32.mxu0 %v614_v1  ;;  %751 = vmatprep.mubr.f32.mxu1 %v614_v1  ;;  %v537_v10 = vld [vmem:[%s1333_s5 + $0x1a0] sm:$0xff]  ;;  %v543_v11 = vld [vmem:[%s1333_s5 + $0x1d0] sm:$0xff]  ;;  %v540_v12 = vld [vmem:[%s1333_s5 + $0x1b8] sm:$0xff] }
  0x5d   : > { %618 = vmatprep.subr.mxu0 %v542_v4  ;;  %689 = vmatprep.subr.mxu1 %v544_v9  ;;  %v534_v13 = vld [vmem:[%s1333_s5 + $0x188] sm:$0xff]  ;;  %v539_v14 = vld [vmem:[%s1333_s5 + $0x1b0] sm:$0xff]  ;;  %v533_v15 = vld [vmem:[%s1333_s5 + $0x180] sm:$0xff] }
  0x5e   : > { %619 = vmatpush1.msra.mxu0 %v541_v6  ;;  %690 = vmatpush1.msra.mxu1 %v543_v11  ;;  %v536_v16 = vld [vmem:[%s1333_s5 + $0x198] sm:$0xff]  ;;  %v530_v17 = vld [vmem:[%s1333_s5 + $0x168] sm:$0xff]  ;;  %v535_v18 = vld [vmem:[%s1333_s5 + $0x190] sm:$0xff] }
  0x5f   : > { %620 = vmatprep.subr.mxu0 %v538_v8  ;;  %691 = vmatprep.subr.mxu1 %v540_v12  ;;  %v529_v19 = vld [vmem:[%s1333_s5 + $0x160] sm:$0xff]  ;;  %v532_v20 = vld [vmem:[%s1333_s5 + $0x178] sm:$0xff]  ;;  %v526_v21 = vld [vmem:[%s1333_s5 + $0x148] sm:$0xff] }
  0x60   : > { %621 = vmatpush1.msra.mxu0 %v537_v10  ;;  %692 = vmatpush1.msra.mxu1 %v539_v14  ;;  %v531_v22 = vld [vmem:[%s1333_s5 + $0x170] sm:$0xff]  ;;  %v525_v23 = vld [vmem:[%s1333_s5 + $0x140] sm:$0xff]  ;;  %v528_v24 = vld [vmem:[%s1333_s5 + $0x158] sm:$0xff] }
  0x61   : > { %622 = vmatprep.subr.mxu0 %v534_v13  ;;  %693 = vmatprep.subr.mxu1 %v536_v16  ;;  %v522_v25 = vld [vmem:[%s1333_s5 + $0x128] sm:$0xff]  ;;  %v527_v26 = vld [vmem:[%s1333_s5 + $0x150] sm:$0xff]  ;;  %v521_v27 = vld [vmem:[%s1333_s5 + $0x120] sm:$0xff] }
  0x62   : > { %623 = vmatpush1.msra.mxu0 %v533_v15  ;;  %694 = vmatpush1.msra.mxu1 %v535_v18  ;;  %v524_v28 = vld [vmem:[%s1333_s5 + $0x138] sm:$0xff]  ;;  %v518_v29 = vld [vmem:[%s1333_s5 + $0x108] sm:$0xff]  ;;  %v523_v30 = vld [vmem:[%s1333_s5 + $0x130] sm:$0xff] }
  0x63   : > { %624 = vmatprep.subr.mxu0 %v530_v17  ;;  %695 = vmatprep.subr.mxu1 %v532_v20  ;;  %v517_v31 = vld [vmem:[%s1333_s5 + $0x100] sm:$0xff]  ;;  %v520_v32 = vld [vmem:[%s1333_s5 + $0x118] sm:$0xff]  ;;  %v514_v33 = vld [vmem:[%s1333_s5 + $0xe8] sm:$0xff] }
  0x64   : > { %625 = vmatpush1.msra.mxu0 %v529_v19  ;;  %696 = vmatpush1.msra.mxu1 %v531_v22  ;;  %v519_v34 = vld [vmem:[%s1333_s5 + $0x110] sm:$0xff]  ;;  %v513_v35 = vld [vmem:[%s1333_s5 + $0xe0] sm:$0xff]  ;;  %v516_v36 = vld [vmem:[%s1333_s5 + $0xf8] sm:$0xff] }
  0x65   : > { %626 = vmatprep.subr.mxu0 %v526_v21  ;;  %697 = vmatprep.subr.mxu1 %v528_v24  ;;  %v510_v37 = vld [vmem:[%s1333_s5 + $0xc8] sm:$0xff]  ;;  %v515_v38 = vld [vmem:[%s1333_s5 + $0xf0] sm:$0xff]  ;;  %v509_v39 = vld [vmem:[%s1333_s5 + $0xc0] sm:$0xff] }
  0x66   : > { %627 = vmatpush1.msra.mxu0 %v525_v23  ;;  %698 = vmatpush1.msra.mxu1 %v527_v26  ;;  %v512_v40 = vld [vmem:[%s1333_s5 + $0xd8] sm:$0xff]  ;;  %v506_v41 = vld [vmem:[%s1333_s5 + $0xa8] sm:$0xff]  ;;  %v511_v42 = vld [vmem:[%s1333_s5 + $0xd0] sm:$0xff] }
  0x67   : > { %628 = vmatprep.subr.mxu0 %v522_v25  ;;  %699 = vmatprep.subr.mxu1 %v524_v28  ;;  %v505_v43 = vld [vmem:[%s1333_s5 + $0xa0] sm:$0xff]  ;;  %v508_v44 = vld [vmem:[%s1333_s5 + $0xb8] sm:$0xff]  ;;  %v502_v45 = vld [vmem:[%s1333_s5 + $0x88] sm:$0xff] }
  0x68   : > { %629 = vmatpush1.msra.mxu0 %v521_v27  ;;  %700 = vmatpush1.msra.mxu1 %v523_v30  ;;  %v507_v46 = vld [vmem:[%s1333_s5 + $0xb0] sm:$0xff]  ;;  %v501_v47 = vld [vmem:[%s1333_s5 + $0x80] sm:$0xff]  ;;  %v504_v48 = vld [vmem:[%s1333_s5 + $0x98] sm:$0xff] }
  0x69   : > { %630 = vmatprep.subr.mxu0 %v518_v29  ;;  %701 = vmatprep.subr.mxu1 %v520_v32  ;;  %v498_v49 = vld [vmem:[%s1333_s5 + $0x68] sm:$0xff]  ;;  %v503_v50 = vld [vmem:[%s1333_s5 + $0x90] sm:$0xff]  ;;  %v497_v51 = vld [vmem:[%s1333_s5 + $0x60] sm:$0xff] }
  0x6a   : > { %631 = vmatpush1.msra.mxu0 %v517_v31  ;;  %702 = vmatpush1.msra.mxu1 %v519_v34  ;;  %v500_v52 = vld [vmem:[%s1333_s5 + $0x78] sm:$0xff]  ;;  %v494_v53 = vld [vmem:[%s1333_s5 + $0x48] sm:$0xff]  ;;  %v499_v54 = vld [vmem:[%s1333_s5 + $0x70] sm:$0xff] }
  0x6b   : > { %632 = vmatprep.subr.mxu0 %v514_v33  ;;  %703 = vmatprep.subr.mxu1 %v516_v36  ;;  %v493_v55 = vld [vmem:[%s1333_s5 + $0x40] sm:$0xff]  ;;  %v496_v56 = vld [vmem:[%s1333_s5 + $0x58] sm:$0xff]  ;;  %v490_v57 = vld [vmem:[%s1333_s5 + $0x28] sm:$0xff] }
  0x6c   : > { %633 = vmatpush1.msra.mxu0 %v513_v35  ;;  %704 = vmatpush1.msra.mxu1 %v515_v38  ;;  %v495_v58 = vld [vmem:[%s1333_s5 + $0x50] sm:$0xff]  ;;  %v489_v59 = vld [vmem:[%s1333_s5 + $0x20] sm:$0xff]  ;;  %v492_v60 = vld [vmem:[%s1333_s5 + $0x38] sm:$0xff] }
  0x6d   : > { %634 = vmatprep.subr.mxu0 %v510_v37  ;;  %705 = vmatprep.subr.mxu1 %v512_v40  ;;  %v486_v61 = vld [vmem:[%s1333_s5 + $0x8] sm:$0xff]  ;;  %v491_v62 = vld [vmem:[%s1333_s5 + $0x30] sm:$0xff]  ;;  %v485_v63 = vld [vmem:[%s1333_s5] sm:$0xff] }
  0x6e   : > { %635 = vmatpush1.msra.mxu0 %v509_v39  ;;  %706 = vmatpush1.msra.mxu1 %v511_v42  ;;  %v488_v1 = vld [vmem:[%s1333_s5 + $0x18] sm:$0xff]  ;;  %v610_v2 = vld [vmem:[%s1333_s5 + $0x3e8] sm:$0xff]  ;;  %v487_v3 = vld [vmem:[%s1333_s5 + $0x10] sm:$0xff] }
  0x6f   : > { %636 = vmatprep.subr.mxu0 %v506_v41  ;;  %707 = vmatprep.subr.mxu1 %v508_v44  ;;  %v609_v4 = vld [vmem:[%s1333_s5 + $0x3e0] sm:$0xff]  ;;  %v612_v5 = vld [vmem:[%s1333_s5 + $0x3f8] sm:$0xff]  ;;  %v606_v6 = vld [vmem:[%s1333_s5 + $0x3c8] sm:$0xff] }
  0x70   : > { %637 = vmatpush1.msra.mxu0 %v505_v43  ;;  %708 = vmatpush1.msra.mxu1 %v507_v46  ;;  %v611_v7 = vld [vmem:[%s1333_s5 + $0x3f0] sm:$0xff]  ;;  %v605_v8 = vld [vmem:[%s1333_s5 + $0x3c0] sm:$0xff]  ;;  %v608_v9 = vld [vmem:[%s1333_s5 + $0x3d8] sm:$0xff] }
  0x71   : > { %638 = vmatprep.subr.mxu0 %v502_v45  ;;  %709 = vmatprep.subr.mxu1 %v504_v48  ;;  %v602_v10 = vld [vmem:[%s1333_s5 + $0x3a8] sm:$0xff]  ;;  %v607_v11 = vld [vmem:[%s1333_s5 + $0x3d0] sm:$0xff]  ;;  %v601_v12 = vld [vmem:[%s1333_s5 + $0x3a0] sm:$0xff] }
  0x72   : > { %639 = vmatpush1.msra.mxu0 %v501_v47  ;;  %710 = vmatpush1.msra.mxu1 %v503_v50  ;;  %v604_v13 = vld [vmem:[%s1333_s5 + $0x3b8] sm:$0xff]  ;;  %v598_v14 = vld [vmem:[%s1333_s5 + $0x388] sm:$0xff]  ;;  %v603_v15 = vld [vmem:[%s1333_s5 + $0x3b0] sm:$0xff] }
  0x73   : > { %640 = vmatprep.subr.mxu0 %v498_v49  ;;  %711 = vmatprep.subr.mxu1 %v500_v52  ;;  %v597_v16 = vld [vmem:[%s1333_s5 + $0x380] sm:$0xff]  ;;  %v600_v17 = vld [vmem:[%s1333_s5 + $0x398] sm:$0xff]  ;;  %v594_v18 = vld [vmem:[%s1333_s5 + $0x368] sm:$0xff] }
  0x74   : > { %641 = vmatpush1.msra.mxu0 %v497_v51  ;;  %712 = vmatpush1.msra.mxu1 %v499_v54  ;;  %v599_v19 = vld [vmem:[%s1333_s5 + $0x390] sm:$0xff]  ;;  %v593_v20 = vld [vmem:[%s1333_s5 + $0x360] sm:$0xff]  ;;  %v596_v21 = vld [vmem:[%s1333_s5 + $0x378] sm:$0xff] }
  0x75   : > { %642 = vmatprep.subr.mxu0 %v494_v53  ;;  %713 = vmatprep.subr.mxu1 %v496_v56  ;;  %v590_v22 = vld [vmem:[%s1333_s5 + $0x348] sm:$0xff]  ;;  %v595_v23 = vld [vmem:[%s1333_s5 + $0x370] sm:$0xff]  ;;  %v589_v24 = vld [vmem:[%s1333_s5 + $0x340] sm:$0xff] }
  0x76   : > { %643 = vmatpush1.msra.mxu0 %v493_v55  ;;  %714 = vmatpush1.msra.mxu1 %v495_v58  ;;  %v592_v25 = vld [vmem:[%s1333_s5 + $0x358] sm:$0xff]  ;;  %v586_v26 = vld [vmem:[%s1333_s5 + $0x328] sm:$0xff]  ;;  %v591_v27 = vld [vmem:[%s1333_s5 + $0x350] sm:$0xff] }
  0x77   : > { %644 = vmatprep.subr.mxu0 %v490_v57  ;;  %715 = vmatprep.subr.mxu1 %v492_v60  ;;  %v585_v28 = vld [vmem:[%s1333_s5 + $0x320] sm:$0xff]  ;;  %v588_v29 = vld [vmem:[%s1333_s5 + $0x338] sm:$0xff]  ;;  %v582_v30 = vld [vmem:[%s1333_s5 + $0x308] sm:$0xff] }
  0x78   : > { %645 = vmatpush1.msra.mxu0 %v489_v59  ;;  %716 = vmatpush1.msra.mxu1 %v491_v62  ;;  %v587_v31 = vld [vmem:[%s1333_s5 + $0x330] sm:$0xff]  ;;  %v581_v32 = vld [vmem:[%s1333_s5 + $0x300] sm:$0xff]  ;;  %v584_v33 = vld [vmem:[%s1333_s5 + $0x318] sm:$0xff] }
  0x79   : > { %646 = vmatprep.subr.mxu0 %v486_v61  ;;  %717 = vmatprep.subr.mxu1 %v488_v1  ;;  %v578_v34 = vld [vmem:[%s1333_s5 + $0x2e8] sm:$0xff]  ;;  %v583_v35 = vld [vmem:[%s1333_s5 + $0x310] sm:$0xff]  ;;  %v577_v36 = vld [vmem:[%s1333_s5 + $0x2e0] sm:$0xff] }
  0x7a   : > { %647 = vmatpush1.msra.mxu0 %v485_v63  ;;  %718 = vmatpush1.msra.mxu1 %v487_v3  ;;  %v580_v37 = vld [vmem:[%s1333_s5 + $0x2f8] sm:$0xff]  ;;  %v574_v38 = vld [vmem:[%s1333_s5 + $0x2c8] sm:$0xff]  ;;  %v579_v39 = vld [vmem:[%s1333_s5 + $0x2f0] sm:$0xff] }
  0x7b   : > { %648 = vmatprep.subr.mxu0 %v610_v2  ;;  %719 = vmatprep.subr.mxu1 %v612_v5  ;;  %v573_v40 = vld [vmem:[%s1333_s5 + $0x2c0] sm:$0xff]  ;;  %v576_v41 = vld [vmem:[%s1333_s5 + $0x2d8] sm:$0xff]  ;;  %v570_v42 = vld [vmem:[%s1333_s5 + $0x2a8] sm:$0xff] }
  0x7c   : > { %649 = vmatpush2.msra.mxu0 %v609_v4  ;;  %720 = vmatpush2.msra.mxu1 %v611_v7  ;;  %v575_v43 = vld [vmem:[%s1333_s5 + $0x2d0] sm:$0xff]  ;;  %v569_v44 = vld [vmem:[%s1333_s5 + $0x2a0] sm:$0xff]  ;;  %v572_v45 = vld [vmem:[%s1333_s5 + $0x2b8] sm:$0xff] }
  0x7d   : > { %650 = vmatprep.subr.mxu0 %v606_v6  ;;  %721 = vmatprep.subr.mxu1 %v608_v9  ;;  %v566_v46 = vld [vmem:[%s1333_s5 + $0x288] sm:$0xff]  ;;  %v571_v47 = vld [vmem:[%s1333_s5 + $0x2b0] sm:$0xff]  ;;  %v565_v48 = vld [vmem:[%s1333_s5 + $0x280] sm:$0xff] }
  0x7e   : > { %651 = vmatpush2.msra.mxu0 %v605_v8  ;;  %722 = vmatpush2.msra.mxu1 %v607_v11  ;;  %v568_v49 = vld [vmem:[%s1333_s5 + $0x298] sm:$0xff]  ;;  %v562_v50 = vld [vmem:[%s1333_s5 + $0x268] sm:$0xff]  ;;  %v567_v51 = vld [vmem:[%s1333_s5 + $0x290] sm:$0xff] }
  0x7f   : > { %652 = vmatprep.subr.mxu0 %v602_v10  ;;  %723 = vmatprep.subr.mxu1 %v604_v13  ;;  %v561_v52 = vld [vmem:[%s1333_s5 + $0x260] sm:$0xff]  ;;  %v564_v53 = vld [vmem:[%s1333_s5 + $0x278] sm:$0xff]  ;;  %v558_v54 = vld [vmem:[%s1333_s5 + $0x248] sm:$0xff] }
  0x80   : > { %653 = vmatpush2.msra.mxu0 %v601_v12  ;;  %724 = vmatpush2.msra.mxu1 %v603_v15  ;;  %v563_v55 = vld [vmem:[%s1333_s5 + $0x270] sm:$0xff]  ;;  %v557_v56 = vld [vmem:[%s1333_s5 + $0x240] sm:$0xff]  ;;  %v560_v57 = vld [vmem:[%s1333_s5 + $0x258] sm:$0xff] }
  0x81   : > { %654 = vmatprep.subr.mxu0 %v598_v14  ;;  %725 = vmatprep.subr.mxu1 %v600_v17  ;;  %v554_v58 = vld [vmem:[%s1333_s5 + $0x228] sm:$0xff]  ;;  %v559_v59 = vld [vmem:[%s1333_s5 + $0x250] sm:$0xff]  ;;  %v553_v60 = vld [vmem:[%s1333_s5 + $0x220] sm:$0xff] }
  0x82   : > { %655 = vmatpush2.msra.mxu0 %v597_v16  ;;  %726 = vmatpush2.msra.mxu1 %v599_v19  ;;  %v556_v61 = vld [vmem:[%s1333_s5 + $0x238] sm:$0xff]  ;;  %v550_v62 = vld [vmem:[%s1333_s5 + $0x208] sm:$0xff]  ;;  %v555_v63 = vld [vmem:[%s1333_s5 + $0x230] sm:$0xff] }
  0x83   : > { %656 = vmatprep.subr.mxu0 %v594_v18  ;;  %727 = vmatprep.subr.mxu1 %v596_v21  ;;  %v549_v1 = vld [vmem:[%s1333_s5 + $0x200] sm:$0xff]  ;;  %v552_v2 = vld [vmem:[%s1333_s5 + $0x218] sm:$0xff]  ;;  %v551_v3 = vld [vmem:[%s1333_s5 + $0x210] sm:$0xff] }
  0x84   : > { %657 = vmatpush2.msra.mxu0 %v593_v20  ;;  %728 = vmatpush2.msra.mxu1 %v595_v23 }
  0x85   : > { %658 = vmatprep.subr.mxu0 %v590_v22  ;;  %729 = vmatprep.subr.mxu1 %v592_v25 }
  0x86   : > { %659 = vmatpush2.msra.mxu0 %v589_v24  ;;  %730 = vmatpush2.msra.mxu1 %v591_v27 }
  0x87   : > { %660 = vmatprep.subr.mxu0 %v586_v26  ;;  %731 = vmatprep.subr.mxu1 %v588_v29 }
  0x88   : > { %661 = vmatpush2.msra.mxu0 %v585_v28  ;;  %732 = vmatpush2.msra.mxu1 %v587_v31 }
  0x89   : > { %662 = vmatprep.subr.mxu0 %v582_v30  ;;  %733 = vmatprep.subr.mxu1 %v584_v33 }
  0x8a   : > { %663 = vmatpush2.msra.mxu0 %v581_v32  ;;  %734 = vmatpush2.msra.mxu1 %v583_v35 }
  0x8b   : > { %664 = vmatprep.subr.mxu0 %v578_v34  ;;  %735 = vmatprep.subr.mxu1 %v580_v37 }
  0x8c   : > { %665 = vmatpush2.msra.mxu0 %v577_v36  ;;  %736 = vmatpush2.msra.mxu1 %v579_v39 }
  0x8d   : > { %666 = vmatprep.subr.mxu0 %v574_v38  ;;  %737 = vmatprep.subr.mxu1 %v576_v41 }
  0x8e   : > { %667 = vmatpush2.msra.mxu0 %v573_v40  ;;  %738 = vmatpush2.msra.mxu1 %v575_v43 }
  0x8f   : > { %668 = vmatprep.subr.mxu0 %v570_v42  ;;  %739 = vmatprep.subr.mxu1 %v572_v45 }
  0x90   : > { %669 = vmatpush2.msra.mxu0 %v569_v44  ;;  %740 = vmatpush2.msra.mxu1 %v571_v47 }
  0x91   : > { %670 = vmatprep.subr.mxu0 %v566_v46  ;;  %741 = vmatprep.subr.mxu1 %v568_v49 }
  0x92   : > { %671 = vmatpush2.msra.mxu0 %v565_v48  ;;  %742 = vmatpush2.msra.mxu1 %v567_v51 }
  0x93   : > { %672 = vmatprep.subr.mxu0 %v562_v50  ;;  %743 = vmatprep.subr.mxu1 %v564_v53 }
  0x94   : > { %673 = vmatpush2.msra.mxu0 %v561_v52  ;;  %744 = vmatpush2.msra.mxu1 %v563_v55 }
  0x95   : > { %674 = vmatprep.subr.mxu0 %v558_v54  ;;  %745 = vmatprep.subr.mxu1 %v560_v57 }
  0x96   : > { %675 = vmatpush2.msra.mxu0 %v557_v56  ;;  %746 = vmatpush2.msra.mxu1 %v559_v59 }
  0x97   : > { %676 = vmatprep.subr.mxu0 %v554_v58  ;;  %747 = vmatprep.subr.mxu1 %v556_v61 }
  0x98   : > { %677 = vmatpush2.msra.mxu0 %v553_v60  ;;  %748 = vmatpush2.msra.mxu1 %v555_v63 }
  0x99   : > { %678 = vmatprep.subr.mxu0 %v550_v62  ;;  %749 = vmatprep.subr.mxu1 %v552_v2 }
  0x9a   : > { %679 = vmatpush2.msra.mxu0 %v549_v1  ;;  %750 = vmatpush2.msra.mxu1 %v551_v3 }
  0x9b   : > { %681 = vmatmul.mubr.f32.vlgmr.msra.gmra.mxu0 %v1329_v0  ;;  %752 = vmatmul.mubr.f32.vlgmr.msra.gmra.mxu1 %v1329_v0 }
 0x15b   : > { %v682_v4 = vpop.f32.mrf.mxu0  ;;  %v753_v6 = vpop.f32.mrf.mxu1 }
 0x15c   : > { %v780_v5 = vmul.f32 %v682_v4, %v682_v4  ;;  %v769_v7 = vsel %vm768_vm0, %v682_v4, 0.0  ;;  %v782_v9 = vmul.f32 %v753_v6, %v753_v6  ;;  %v772_v13 = vsel %vm768_vm0, %v753_v6, 0.0 }
 0x15d   : > { %v684_v8 = vpop.f32.mrf.mxu0  ;;  %v755_v12 = vpop.f32.mrf.mxu1 }
 0x15e   : > { %v762_v10 = vcombine.low %v682_v4, %v684_v8  ;;  %v770_v11 = vsel %vm768_vm0, %v684_v8, 0.0  ;;  %v781_v0 = vmul.f32 %v684_v8, %v684_v8  ;;  %v763_v15 = vcombine.low %v753_v6, %v755_v12 }
 0x15f   : > { %v771_v14 = vadd.f32 %v770_v11, %v769_v7  ;;  %v784_v16 = vsel %vm768_vm0, %v780_v5, 0.0  ;;  %v787_v18 = vsel %vm768_vm0, %v782_v9, 0.0  ;;  %v783_v21 = vmul.f32 %v755_v12, %v755_v12 }
 0x160   : > { %766 = vst [vmem:[%s475_s10] sm:$0xff] %v762_v10  ;;  %v785_v17 = vsel %vm768_vm0, %v781_v0, 0.0  ;;  %767 = vst [vmem:[%s475_s10 + $0x8] sm:$0xff] %v763_v15  ;;  %v774_v22 = vsel %vm768_vm0, %v755_v12, 0.0 }
 0x161   : > { %v786_v19 = vadd.f32 %v785_v17, %v784_v16  ;;  %v773_v20 = vadd.f32 %v772_v13, %v771_v14  ;;  %v789_v25 = vsel %vm768_vm0, %v783_v21, 0.0 }
 0x163   : > { %v775_v23 = vadd.f32 %v774_v22, %v773_v20  ;;  %v788_v24 = vadd.f32 %v787_v18, %v786_v19 }
 0x165   : > { %776 = vadd.xlane.f32.xlu0 %v775_v23  ;;  %v790_v26 = vadd.f32 %v789_v25, %v788_v24 }
 0x169   : > { %791 = vadd.xlane.f32.xlu0 %v790_v26 }
 0x1ee   : > { %v777_v27 = vpop.xlane.xlu0 %776 }
 0x1ef   : > { %779 = vst.msk [vmem:[%s482_s19] sm:$0xf] %vm778_vm1, %v777_v27 }
 0x1f2   : > { %v792_v28 = vpop.xlane.xlu0 %791 }
 0x1f3   : > { %794 = vst.msk [vmem:[%s482_s19] sm:$0xf] %vm793_vm2, %v792_v28 }
 0x1f4 PF: > { %s14_s16 = sadd.s32 1, %s998_s16   ;;  %s1501_s12 = smov %s986_s13 }
 0x1f5   : > { %p11_p11 = scmp.ge.s32.totalorder %s14_s16, 4   ;;  %s1502_s13 = smov %s1055_s20 }
 0x1f6   : > { %s1503_s14 = smov %s994_s15  ;;  %s1504_s15 = smov %s1506_s17 }
 0x1f7   :  { %13 = sbr.rel (!%p11_p11) target bundleno = 3 (0x3), region = 98 }

// kernel: mid_blocks_forward.7
= control target key start
LH: loop header
LB: loop body
LE: loop exit
PB: predicated region body
PF: predicated region fallthrough
CT: control target
= control target key end

     0   :  { %s426_s9 = smov 0   ;;  %s428_s10 = smov 0   ;;  %s467_s0 = inlined_call_operand.vmem [shape: f32[4,1024], index: 0, kind: input, shape index: {}]   ;;  %s468_s1 = inlined_call_operand.vmem [shape: f32[2,4,4,1], index: 1, kind: input, shape index: {}]   ;;  %s469_s2 = inlined_call_operand.vmem [shape: f32[4,1024], index: 2, kind: output, shape index: {}]  }
   0x1   :  { %s430_s11 = smov 0  }
   0x2 LB: > { %s24_s12 = sadd.s32 1, %s403_s10  ;;  %p344_p0 = scmp.ge.s32.totalorder %s407_s11, 1  ;;  %s407_s11 = sphi %s430_s11, %s12_s11   ;;  %s403_s10 = sphi %s428_s10, %s471_s10   ;;  %s399_s9 = sphi %s426_s9, %s470_s9  }
   0x3   : > { %p26_p1 = scmp.ge.s32.totalorder %s24_s12, 2  ;;  %p141_p2 = scmp.lt.s32.totalorder %s407_s11, 3 }
   0x5   : > { %s473_s12 = smov (%p26_p1, %s24_s12), 0  ;;  %p142_p3 = pnand %p344_p0, %p141_p2 }
   0x6   : > { %p178_p4 = scmp.lt.s32.totalorder (!%p142_p3), %s399_s9, 1  ;;  %s345_s18 = sshll.u32 (!%p142_p3), %s399_s9, 2 }
   0x7   : > { %145 = sbr.rel (%p142_p3) target bundleno = 156 (0x9c), region = 28  ;;  %p172_p5 = scmp.lt.s32.totalorder (!%p142_p3), %s345_s18, 7 }
   0xc   : > { %v409_v0 = vmov 0   ;;  %s179_s13 = scalar_select %p178_p4, %s399_s9, 1  ;;  %v410_v5 = vmov 839922192   ;;  %v207_v7 = vlaneseq }
   0xd   : > { %383 = vset.pattern.permute.xlu0 %v409_v0  ;;  %384 = vset.pattern.permute.xlu1 %v409_v0  ;;  %v205_v6 = vunpack.c.l.s4 %v410_v5  ;;  %s475_s18 = smov (!%p172_p5, %s345_s18), 7 }
   0xe   : > { %s356_s14 = sshll.u32 %s179_s13, 4  ;;  %v208_v9 = vshrl.u32 %v207_v7, 7  ;;  %s346_s19 = sshll.u32 %s475_s18, 2 }
   0xf   : > { %s182_s17 = scalar_lea.vmem %s468_s1, %s356_s14  ;;  %v206_v8 = vunpack.c.0.s8 %v205_v6  ;;  %s175_s22 = scalar_lea.vmem %s467_s0, %s346_s19 }
  0x10   : > { %v191_v1 = vld [vmem:[%s182_s17] sm:$0xf]  ;;  %v352_v2 = vld [vmem:[%s182_s17 + $0x8] sm:$0xf]  ;;  %v351_v3 = vld [vmem:[%s182_s17 + $0x4] sm:$0xf]  ;;  %s188_s25 = scalar_lea.vmem %s469_s2, %s346_s19 }
  0x11   : > { %202 = vperm.xlu0 %383, %v191_v1   ;;  %232 = vperm.xlu1 %384, %v352_v2   ;;  %v353_v4 = vld [vmem:[%s182_s17 + $0xc] sm:$0xf]  ;;  %v209_v10 = vsub.s32 %v206_v8, %v208_v9  ;;  %v198_v13 = vld [vmem:[%s175_s22] sm:$0xff] }
  0x12   : > { %v199_v14 = vld [vmem:[%s175_s22 + $0x8] sm:$0xff] }
  0x15   : > { %216 = vperm.xlu0 %383, %v351_v3   ;;  %246 = vperm.xlu1 %384, %v353_v4  }
  0x8c   : > { %v203_v11 = vpop.permute.xlu0 %202  ;;  %v233_v15 = vpop.permute.xlu1 %232 }
  0x8d   : > { %v210_v12 = vrot.slane %v203_v11, %v209_v10  ;;  %v240_v23 = vrot.slane %v233_v15, %v209_v10 }
  0x8f   : > { %v212_v17 = vmul.f32 %v210_v12, %v198_v13  ;;  %v213_v18 = vmul.f32 %v210_v12, %v199_v14 }
  0x90   : > { %v217_v16 = vpop.permute.xlu0 %216  ;;  %v247_v22 = vpop.permute.xlu1 %246 }
  0x91   : > { %v224_v19 = vrot.slane %v217_v16, %v209_v10  ;;  %v254_v28 = vrot.slane %v247_v22, %v209_v10 }
  0x93   : > { %v226_v20 = vadd.f32 %v224_v19, %v212_v17  ;;  %v227_v21 = vadd.f32 %v224_v19, %v213_v18 }
  0x95   : > { %v228_v24 = vmax.f32 %v226_v20, 0.0  ;;  %v229_v25 = vmax.f32 %v227_v21, 0.0 }
  0x97   : > { %v242_v26 = vmul.f32 %v240_v23, %v228_v24  ;;  %v243_v27 = vmul.f32 %v240_v23, %v229_v25 }
  0x99   : > { %v256_v29 = vadd.f32 %v254_v28, %v242_v26  ;;  %v257_v30 = vadd.f32 %v254_v28, %v243_v27 }
  0x9b   : > { %258 = vst [vmem:[%s188_s25] sm:$0xff] %v256_v29  ;;  %259 = vst [vmem:[%s188_s25 + $0x8] sm:$0xff] %v257_v30 }
  0x9c PF: > { %s12_s11 = sadd.s32 1, %s407_s11   ;;  %s470_s9 = smov %s403_s10 }
  0x9d   : > { %p9_p6 = scmp.ge.s32.totalorder %s12_s11, 4   ;;  %s471_s10 = smov %s473_s12 }
  0x9f   :  { %11 = sbr.rel (!%p9_p6) target bundleno = 2 (0x2), region = 64 }

</bundles_post_ra>
